<compile_context>
chip_gen: v7x
topology: tpu7x:2x2x1
jax: 0.10.0
libtpu: 0.0.40
codegen_flags: <defaults>
</compile_context>

<pallas_src>
import jax
import jax.numpy as jnp
from jax.experimental import pallas as pl
from jax.experimental.pallas import tpu as pltpu


def _channel_attn_kernel(x_ref, w1_ref, w2_ref, cout_ref, wout_ref):
    # x_ref:  (1, C, T)   tile of NCHW-flattened pixels (spatial on the lane axis)
    # w1_ref: (hid, C)    Linear1 weight (PyTorch layout: out x in)
    # w2_ref: (C, hid)    Linear2 weight (PyTorch layout: out x in)
    hp = jax.lax.Precision.HIGHEST
    x = x_ref[0]                                                         # (C, T)
    h = jnp.dot(w1_ref[...], x, preferred_element_type=jnp.float32,
                precision=hp)                                            # (hid, T)
    h = jnp.maximum(h, 0.0)                                              # ReLU
    y = jnp.dot(w2_ref[...], h, preferred_element_type=jnp.float32,
                precision=hp)                                            # (C, T)
    wout_ref[0] = y.astype(wout_ref.dtype)                               # pre-sigmoid weight
    cout_ref[0] = (jax.nn.sigmoid(y) * x.astype(jnp.float32)).astype(cout_ref.dtype)


def _physical_vmem_bytes():
    try:
        return int(pltpu.get_tpu_info().vmem_capacity_bytes)
    except Exception:
        return 64 << 20  # conservative fallback (v7x per-TC VMEM)


def _pick_spatial_tile(C, x_bytes, o_bytes, target, budget):
    """Largest lane-dense spatial tile (multiple of 128) fitting the VMEM budget."""
    # 1 double-buffered input stream + 2 double-buffered output streams of (C, T).
    per_col = C * (2 * x_bytes + 4 * o_bytes)
    max_t = max(128, (budget // per_col) // 128 * 128)
    t = min(target, max_t)
    return max(128, (t // 128) * 128)


def channel_attention(x, w1, w2, *, thw_target=4096, out_dtype=None):
    """x: (B, C, H, W). w1: (C//r, C), w2: (C, C//r) (PyTorch nn.Linear layout, bias=False).

    Returns (channel_out, out_weight), each (B, C, H, W)."""
    B, C, H, W = x.shape
    hid = w1.shape[0]
    assert w1.shape == (hid, C) and w2.shape == (C, hid)
    out_dtype = out_dtype or x.dtype   # pass jnp.bfloat16 to halve output write traffic

    x_bytes = jnp.dtype(x.dtype).itemsize
    o_bytes = jnp.dtype(out_dtype).itemsize
    HW = H * W

    phys_vmem = _physical_vmem_bytes()
    tile_budget = min(int(phys_vmem * 0.5), 64 << 20)
    thw = _pick_spatial_tile(C, x_bytes, o_bytes, thw_target, tile_budget)

    # NCHW -> (B, C, HW) is a free reshape (no transpose, no extra HBM traffic).
    x3 = x.reshape(B, C, HW)

    if HW <= thw:
        # Single full-extent spatial block per batch element: last block dim equals
        # the full array dim -> exempt from the (8,128) rule; zero padded columns.
        thw = HW
        n_tiles = 1
    else:
        # Partial last block is clipped by Pallas; every op is column-independent
        # so undefined columns in the partial input block are harmless.
        n_tiles = pl.cdiv(HW, thw)

    # Order the fully-parallel grid so the larger extent leads: keeps both v7x
    # TensorCores busy even when B == 1; harmless on single-TC v5e/v6e.
    if n_tiles >= B:
        grid = (n_tiles, B)
        def xmap(s, b): return (b, 0, s)
        def wmap(s, b): return (0, 0)
    else:
        grid = (B, n_tiles)
        def xmap(b, s): return (b, 0, s)
        def wmap(b, s): return (0, 0)

    # VMEM actually consumed by the pipeline (already counts double-buffering).
    w_bytes = (hid * C * jnp.dtype(w1.dtype).itemsize
               + C * hid * jnp.dtype(w2.dtype).itemsize)
    vmem_need = (2 * C * thw * x_bytes          # x, double buffered
                 + 4 * C * thw * o_bytes        # two outputs, double buffered
                 + 2 * w_bytes)                 # tiny weights (+ slack)
    vmem_limit = int(min(max(vmem_need + (4 << 20), 32 << 20), int(phys_vmem * 0.75)))

    cout3, wout3 = pl.pallas_call(
        _channel_attn_kernel,
        out_shape=(
            jax.ShapeDtypeStruct((B, C, HW), out_dtype),
            jax.ShapeDtypeStruct((B, C, HW), out_dtype),
        ),
        grid_spec=pltpu.PrefetchScalarGridSpec(
            num_scalar_prefetch=0,
            grid=grid,
            in_specs=[
                pl.BlockSpec((1, C, thw), xmap),     # x tile
                pl.BlockSpec((hid, C), wmap),        # W1 (constant index -> DMA'd once)
                pl.BlockSpec((C, hid), wmap),        # W2 (constant index -> DMA'd once)
            ],
            out_specs=[
                pl.BlockSpec((1, C, thw), xmap),
                pl.BlockSpec((1, C, thw), xmap),
            ],
        ),
        compiler_params=pltpu.CompilerParams(
            dimension_semantics=("parallel", "parallel"),
            vmem_limit_bytes=vmem_limit,
        ),
    )(x3, w1, w2)

    # Restore (B, C, H, W) — a free reshape, no slicing needed.
    return cout3.reshape(B, C, H, W), wout3.reshape(B, C, H, W)


def _reference(x, w1, w2):
    B, C, H, W = x.shape
    xf = jnp.transpose(x.reshape(B, C, H * W), (0, 2, 1))              # (B, HW, C)
    hp = jax.lax.Precision.HIGHEST
    h = jnp.maximum(jnp.einsum("bpc,hc->bph", xf, w1, precision=hp), 0.0)
    y = jnp.einsum("bph,ch->bpc", h, w2, precision=hp)                 # (B, HW, C)
    cout = jax.nn.sigmoid(y)
    cout = jnp.transpose(cout, (0, 2, 1)).reshape(B, C, H, W) * x
    wout = jnp.transpose(y, (0, 2, 1)).reshape(B, C, H, W)
    return cout, wout


if __name__ == "__main__":
    key = jax.random.PRNGKey(0)
    kx, k1, k2 = jax.random.split(key, 3)

    # Shapes consistent with the module: reduction=16 requires C >= 16.
    B, C, H, W = 2, 128, 12, 12
    reduction = 16
    hid = C // reduction  # 8

    x = jax.random.normal(kx, (B, C, H, W), dtype=jnp.float32)
    # Deterministic synthetic weights in PyTorch nn.Linear layout (out, in), bias=False.
    w1 = jax.random.normal(k1, (hid, C), dtype=jnp.float32) * 0.1
    w2 = jax.random.normal(k2, (C, hid), dtype=jnp.float32) * 0.1

    # Case 1: H*W = 144 (not a multiple of 128) -> single full-extent spatial block.
    channel_out, out_weight = channel_attention(x, w1, w2)
    jax.block_until_ready((channel_out, out_weight))
    ref_cout, ref_wout = _reference(x, w1, w2)
    assert channel_out.shape == (B, C, H, W)
    assert out_weight.shape == (B, C, H, W)
    assert jnp.allclose(channel_out, ref_cout, atol=1e-5, rtol=1e-5)
    assert jnp.allclose(out_weight, ref_wout, atol=1e-5, rtol=1e-5)

    # Case 2: tiled path with a partial last block (HW=400, thw=128 -> 4 tiles,
    # last tile 16 valid columns) and B=1 so the spatial axis leads the grid.
    x2 = jax.random.normal(jax.random.PRNGKey(1), (1, C, 20, 20), dtype=jnp.float32)
    cout2, wout2 = channel_attention(x2, w1, w2, thw_target=128)
    jax.block_until_ready((cout2, wout2))
    ref_cout2, ref_wout2 = _reference(x2, w1, w2)
    assert jnp.allclose(cout2, ref_cout2, atol=1e-5, rtol=1e-5)
    assert jnp.allclose(wout2, ref_wout2, atol=1e-5, rtol=1e-5)

    # TODO(synk): max_pool / avg_pool submodules are defined but unused in forward; not implemented.
    print("KERNEL_OK")
</pallas_src>

<mosaic_0001>
module attributes {stable_mosaic.version = 11 : i64} {
  func.func @_channel_attn_kernel(%arg0: i32, %arg1: i32, %arg2: memref<1x128x144xf32, #tpu.memory_space<vmem>>, %arg3: memref<8x128xf32, #tpu.memory_space<vmem>>, %arg4: memref<128x8xf32, #tpu.memory_space<vmem>>, %arg5: memref<1x128x144xf32, #tpu.memory_space<vmem>>, %arg6: memref<1x128x144xf32, #tpu.memory_space<vmem>>) attributes {dimension_semantics = [#tpu.dimension_semantics<parallel>, #tpu.dimension_semantics<parallel>], iteration_bounds = array<i64: 2, 1>, scalar_prefetch = 0 : i64, scratch_operands = 0 : i64, tpu.core_type = #tpu.core_type<tc>, window_params = [{transform_indices = @transform_0, window_bounds = array<i64: 1, 128, 144>}, {pipeline_mode = #tpu.pipeline_mode<synchronous>, transform_indices = @transform_1, window_bounds = array<i64: 8, 128>}, {pipeline_mode = #tpu.pipeline_mode<synchronous>, transform_indices = @transform_2, window_bounds = array<i64: 128, 8>}, {transform_indices = @transform_3, window_bounds = array<i64: 1, 128, 144>}, {transform_indices = @transform_4, window_bounds = array<i64: 1, 128, 144>}]} {
    %c0 = arith.constant 0 : index
    %c0_0 = arith.constant 0 : index
    %c0_1 = arith.constant 0 : index
    %0 = vector.load %arg2[%c0, %c0_0, %c0_1] : memref<1x128x144xf32, #tpu.memory_space<vmem>>, vector<1x128x144xf32>
    %1 = vector.shape_cast %0 : vector<1x128x144xf32> to vector<128x144xf32>
    %c0_2 = arith.constant 0 : index
    %c0_3 = arith.constant 0 : index
    %2 = vector.load %arg3[%c0_2, %c0_3] : memref<8x128xf32, #tpu.memory_space<vmem>>, vector<8x128xf32>
    %cst = arith.constant dense<0.000000e+00> : vector<8x144xf32>
    %3 = tpu.matmul %2, %1, %cst {dimension_numbers = #tpu.dot_dimension_numbers<[1], [0], [0], [1], [0, 0, 1, 1], [], []>, precision = #tpu.contract_precision<fp32>} : vector<8x128xf32>, vector<128x144xf32>, vector<8x144xf32> -> vector<8x144xf32>
    %cst_4 = arith.constant 0.000000e+00 : f32
    %4 = vector.broadcast %cst_4 : f32 to vector<8x144xf32>
    %5 = arith.maximumf %3, %4 : vector<8x144xf32>
    %c0_5 = arith.constant 0 : index
    %c0_6 = arith.constant 0 : index
    %6 = vector.load %arg4[%c0_5, %c0_6] : memref<128x8xf32, #tpu.memory_space<vmem>>, vector<128x8xf32>
    %cst_7 = arith.constant dense<0.000000e+00> : vector<128x144xf32>
    %7 = tpu.matmul %6, %5, %cst_7 {dimension_numbers = #tpu.dot_dimension_numbers<[1], [0], [0], [1], [0, 0, 1, 1], [], []>, precision = #tpu.contract_precision<fp32>} : vector<128x8xf32>, vector<8x144xf32>, vector<128x144xf32> -> vector<128x144xf32>
    %c0_8 = arith.constant 0 : index
    %c0_9 = arith.constant 0 : index
    %c0_10 = arith.constant 0 : index
    %8 = vector.load %arg6[%c0_8, %c0_9, %c0_10] : memref<1x128x144xf32, #tpu.memory_space<vmem>>, vector<1x128x144xf32>
    %9 = vector.shape_cast %8 : vector<1x128x144xf32> to vector<128x144xf32>
    %10 = vector.shape_cast %7 : vector<128x144xf32> to vector<1x128x144xf32>
    tpu.vector_store %arg6[%c0_8, %c0_9, %c0_10], %10 {strides = array<i32>} : memref<1x128x144xf32, #tpu.memory_space<vmem>>, vector<1x128x144xf32>,
    %11 = arith.negf %7 : vector<128x144xf32>
    %12 = math.exp %11 : vector<128x144xf32>
    %cst_11 = arith.constant 1.000000e+00 : f32
    %13 = vector.broadcast %cst_11 : f32 to vector<128x144xf32>
    %14 = arith.addf %13, %12 : vector<128x144xf32>
    %15 = arith.divf %13, %14 : vector<128x144xf32>
    %16 = arith.mulf %15, %1 : vector<128x144xf32>
    %c0_12 = arith.constant 0 : index
    %c0_13 = arith.constant 0 : index
    %c0_14 = arith.constant 0 : index
    %17 = vector.load %arg5[%c0_12, %c0_13, %c0_14] : memref<1x128x144xf32, #tpu.memory_space<vmem>>, vector<1x128x144xf32>
    %18 = vector.shape_cast %17 : vector<1x128x144xf32> to vector<128x144xf32>
    %19 = vector.shape_cast %16 : vector<128x144xf32> to vector<1x128x144xf32>
    tpu.vector_store %arg5[%c0_12, %c0_13, %c0_14], %19 {strides = array<i32>} : memref<1x128x144xf32, #tpu.memory_space<vmem>>, vector<1x128x144xf32>,
    return
  }
  func.func @transform_0(%arg0: i32, %arg1: i32) -> (i32, i32, i32) {
    %c0_i32 = arith.constant 0 : i32
    %c0_i32_0 = arith.constant 0 : i32
    return %arg0, %c0_i32, %arg1 : i32, i32, i32
  }
  func.func @transform_1(%arg0: i32, %arg1: i32) -> (i32, i32) {
    %c0_i32 = arith.constant 0 : i32
    %c0_i32_0 = arith.constant 0 : i32
    %c0_i32_1 = arith.constant 0 : i32
    return %c0_i32, %c0_i32_0 : i32, i32
  }
  func.func @transform_2(%arg0: i32, %arg1: i32) -> (i32, i32) {
    %c0_i32 = arith.constant 0 : i32
    %c0_i32_0 = arith.constant 0 : i32
    %c0_i32_1 = arith.constant 0 : i32
    return %c0_i32, %c0_i32_0 : i32, i32
  }
  func.func @transform_3(%arg0: i32, %arg1: i32) -> (i32, i32, i32) {
    %c0_i32 = arith.constant 0 : i32
    %c0_i32_0 = arith.constant 0 : i32
    return %arg0, %c0_i32, %arg1 : i32, i32, i32
  }
  func.func @transform_4(%arg0: i32, %arg1: i32) -> (i32, i32, i32) {
    %c0_i32 = arith.constant 0 : i32
    %c0_i32_0 = arith.constant 0 : i32
    return %arg0, %c0_i32, %arg1 : i32, i32, i32
  }
}

</mosaic_0001>

<bundles_post_ra>
// kernel: tpu_custom_call.1
= control target key start
LH: loop header
LB: loop body
LE: loop exit
PB: predicated region body
PF: predicated region fallthrough
CT: control target
= control target key end

     0   :  { %s3489_s15 = smov 0   ;;  %s3491_s16 = smov 0   ;;  %s4687_s0 = inlined_call_operand.vmem [shape: f32[2,128,144], index: 0, kind: input, shape index: {}]   ;;  %s4688_s1 = inlined_call_operand.vmem [shape: f32[8,128], index: 1, kind: input, shape index: {}]   ;;  %s4689_s2 = inlined_call_operand.vmem [shape: f32[128,8], index: 2, kind: input, shape index: {}]   ;;  %s4690_s3 = inlined_call_operand.vmem [shape: f32[2,128,144], index: 3, kind: output, shape index: {0}]   ;;  %s4691_s4 = inlined_call_operand.vmem [shape: f32[2,128,144], index: 4, kind: output, shape index: {1}]  }
   0x1   :  { %s3493_s17 = smov 0  }
   0x2 LB: > { %s27_s18 = sadd.s32 1, %s3457_s16  ;;  %p2846_p0 = scmp.ge.s32.totalorder %s3461_s17, 1  ;;  %s3461_s17 = sphi %s3493_s17, %s15_s17   ;;  %s3457_s16 = sphi %s3491_s16, %s4846_s16   ;;  %s3453_s15 = sphi %s3489_s15, %s4845_s15  }
   0x3   : > { %p29_p1 = scmp.ge.s32.totalorder %s27_s18, 2  ;;  %p188_p2 = scmp.lt.s32.totalorder %s3461_s17, 3 }
   0x5   : > { %s4848_s18 = smov (%p29_p1, %s27_s18), 0  ;;  %p189_p3 = pnand %p2846_p0, %p188_p2 }
   0x7   : > { %192 = sbr.rel (%p189_p3) target bundleno = 978 (0x3d2), region = 32 }
   0xe   : > { %p232_p4 = scmp.lt.s32.totalorder %s3453_s15, 1  ;;  %v293_v0 = vld [vmem:[%s4688_s1] sm:$0xff]  ;;  %v4693_v1 = vmov 0.0   ;;  %vm1167_vm0 = vcmask 64512   ;;  %vm2417_vm1 = vcmask 130048  }
   0xf   : > { %390 = vmatprep.mubr.f32.mxu0 %v4693_v1  ;;  %1582 = vmatprep.mubr.f32.mxu1 %v4693_v1  ;;  %v3512_v2 = vand.u32 4294901760, %v293_v0 }
  0x10   : > { %s4850_s15 = smov (!%p232_p4, %s3453_s15), 1 }
  0x11   : > { %s3514_s21 = sshll.u32 %s4850_s15, 8  ;;  %v3529_v12 = vsub.f32 %v293_v0, %v3512_v2 }
  0x12   : > { %s3520_s24 = scalar_lea.vmem %s4687_s0, %s3514_s21  ;;  %s4520_s12 = scalar_lea.vmem %s4691_s4, %s3514_s21 }
  0x13   : > { %v262_v3 = vld [vmem:[%s3520_s24 + $0x8] sm:$0xff]  ;;  %v264_v4 = vld [vmem:[%s3520_s24 + $0x18] sm:$0xff]  ;;  %v261_v5 = vld [vmem:[%s3520_s24] sm:$0xff]  ;;  %4746 = vst [vmem:[#allocation2_spill] sm:$0xff] %v3529_v12  ;;  %v4692_v29 = vand.u32 4294901760, %v3529_v12  ;;  %s4549_s15 = scalar_lea.vmem %s4690_s3, %s3514_s21 }
  0x14   : > { %v294_v6 = vand.u32 4294901760, %v262_v3  ;;  %v298_v7 = vand.u32 4294901760, %v264_v4  ;;  %v263_v8 = vld [vmem:[%s3520_s24 + $0x10] sm:$0xff]  ;;  %v296_v9 = vand.u32 4294901760, %v261_v5  ;;  %v266_v10 = vld [vmem:[%s3520_s24 + $0x28] sm:$0xff]  ;;  %v268_v11 = vld [vmem:[%s3520_s24 + $0x38] sm:$0xff] }
  0x15   : > { %v300_v13 = vand.u32 4294901760, %v263_v8  ;;  %v302_v14 = vand.u32 4294901760, %v266_v10  ;;  %v306_v15 = vand.u32 4294901760, %v268_v11  ;;  %v265_v16 = vld [vmem:[%s3520_s24 + $0x20] sm:$0xff]  ;;  %v267_v17 = vld [vmem:[%s3520_s24 + $0x30] sm:$0xff]  ;;  %v270_v18 = vld [vmem:[%s3520_s24 + $0x48] sm:$0xff]  ;;  %v3560_v42 = vsub.f32 %v3529_v12, %v4692_v29 }
  0x16   : > { %v3534_v19 = vpack.c.bf16 %v298_v7, %v294_v6  ;;  %v272_v20 = vld [vmem:[%s3520_s24 + $0x58] sm:$0xff]  ;;  %v269_v21 = vld [vmem:[%s3520_s24 + $0x40] sm:$0xff]  ;;  %v271_v22 = vld [vmem:[%s3520_s24 + $0x50] sm:$0xff]  ;;  %v304_v26 = vand.u32 4294901760, %v265_v16  ;;  %v308_v27 = vand.u32 4294901760, %v267_v17  ;;  %v310_v28 = vand.u32 4294901760, %v270_v18 }
  0x17   : > { %v3539_v23 = vpack.c.bf16 %v300_v13, %v296_v9  ;;  %v3541_v24 = vpack.c.bf16 %v306_v15, %v302_v14  ;;  %v274_v25 = vld [vmem:[%s3520_s24 + $0x68] sm:$0xff]  ;;  %v314_v30 = vand.u32 4294901760, %v272_v20  ;;  %v312_v31 = vand.u32 4294901760, %v269_v21  ;;  %v276_v33 = vld [vmem:[%s3520_s24 + $0x78] sm:$0xff]  ;;  %v273_v36 = vld [vmem:[%s3520_s24 + $0x60] sm:$0xff] }
  0x18   : > { %4747 = vst [vmem:[#allocation3_spill] sm:$0xff] %v3534_v19  ;;  %2891 = vmatprep.subr.bf16.mxu0 %v3534_v19  ;;  %v316_v32 = vand.u32 4294901760, %v271_v22  ;;  %v3549_v34 = vpack.c.bf16 %v308_v27, %v304_v26  ;;  %v318_v35 = vand.u32 4294901760, %v274_v25  ;;  %v275_v37 = vld [vmem:[%s3520_s24 + $0x70] sm:$0xff]  ;;  %v278_v39 = vld [vmem:[%s3520_s24 + $0x88] sm:$0xff]  ;;  %v280_v40 = vld [vmem:[%s3520_s24 + $0x98] sm:$0xff]  ;;  %v3562_v43 = vsub.f32 %v262_v3, %v294_v6 }
  0x19   : > { %4748 = vst [vmem:[#allocation4_spill] sm:$0xff] %v3539_v23  ;;  %4749 = vst [vmem:[#allocation5_spill] sm:$0xff] %v3541_v24  ;;  %2893 = vmatpush1.bf16.msra.mxu0 %v3539_v23  ;;  %v3553_v38 = vpack.c.bf16 %v314_v30, %v310_v28  ;;  %v322_v41 = vand.u32 4294901760, %v276_v33  ;;  %v320_v45 = vand.u32 4294901760, %v273_v36  ;;  %v324_v46 = vand.u32 4294901760, %v275_v37  ;;  %v277_v51 = vld [vmem:[%s3520_s24 + $0x80] sm:$0xff] }
  0x1a   : > { %2895 = vmatprep.subr.bf16.mxu0 %v3541_v24  ;;  %4750 = vst [vmem:[#allocation6_spill] sm:$0xff] %v3549_v34  ;;  %v3565_v44 = vpack.c.bf16 %v316_v32, %v312_v31  ;;  %v3567_v47 = vsub.f32 %v264_v4, %v298_v7  ;;  %v326_v49 = vand.u32 4294901760, %v278_v39  ;;  %v330_v50 = vand.u32 4294901760, %v280_v40  ;;  %v279_v52 = vld [vmem:[%s3520_s24 + $0x90] sm:$0xff]  ;;  %v282_v57 = vld [vmem:[%s3520_s24 + $0xa8] sm:$0xff]  ;;  %v284_v58 = vld [vmem:[%s3520_s24 + $0xb8] sm:$0xff] }
  0x1b   : > { %4751 = vst [vmem:[#allocation7_spill] sm:$0xff] %v3553_v38  ;;  %v3570_v48 = vpack.c.bf16 %v322_v41, %v318_v35  ;;  %v3574_v53 = vsub.f32 %v261_v5, %v296_v9  ;;  %v3576_v54 = vsub.f32 %v263_v8, %v300_v13  ;;  %v3578_v55 = vsub.f32 %v266_v10, %v302_v14  ;;  %v281_v5 = vld [vmem:[%s3520_s24 + $0xa0] sm:$0xff]  ;;  %v283_v6 = vld [vmem:[%s3520_s24 + $0xb0] sm:$0xff]  ;;  %v288_v13 = vld [vmem:[%s3520_s24 + $0xd8] sm:$0xff] }
  0x1c   : > { %4752 = vst [vmem:[#allocation8_spill] sm:$0xff] %v3565_v44  ;;  %v3580_v56 = vsub.f32 %v268_v11, %v306_v15  ;;  %v3584_v59 = vsub.f32 %v265_v16, %v304_v26  ;;  %v3586_v60 = vsub.f32 %v267_v17, %v308_v27  ;;  %v3588_v61 = vsub.f32 %v270_v18, %v310_v28  ;;  %v286_v11 = vld [vmem:[%s3520_s24 + $0xc8] sm:$0xff]  ;;  %v3615_v18 = vld [vmem:[%s3520_s24 + $0xc0] sm:$0xff] }
  0x1d   : > { %2897 = vmatpush1.bf16.msra.mxu0 %v3549_v34  ;;  %4753 = vst [vmem:[#allocation9_spill] sm:$0xff] %v3570_v48  ;;  %v3590_v62 = vsub.f32 %v272_v20, %v314_v30  ;;  %v3593_v63 = vsub.f32 %v269_v21, %v312_v31  ;;  %v3595_v0 = vpack.c.bf16 %v324_v46, %v320_v45  ;;  %v328_v3 = vand.u32 4294901760, %v277_v51  ;;  %v3618_v20 = vld [vmem:[%s3520_s24 + $0xd0] sm:$0xff] }
  0x1e   : > { %2899 = vmatprep.subr.bf16.mxu0 %v3553_v38  ;;  %v332_v4 = vand.u32 4294901760, %v279_v52  ;;  %v3599_v7 = vsub.f32 %v271_v22, %v316_v32  ;;  %v3602_v8 = vpack.c.bf16 %v330_v50, %v326_v49  ;;  %v334_v9 = vand.u32 4294901760, %v282_v57 }
  0x1f   : > { %4754 = vst [vmem:[#allocation10_spill] sm:$0xff] %v3595_v0  ;;  %v338_v10 = vand.u32 4294901760, %v284_v58  ;;  %v3606_v14 = vsub.f32 %v274_v25, %v318_v35  ;;  %v3608_v15 = vsub.f32 %v276_v33, %v322_v41  ;;  %v3610_v16 = vsub.f32 %v273_v36, %v320_v45  ;;  %v3644_v41 = vld [vmem:[%s3520_s24 + $0xf8] sm:$0xff] }
  0x20   : > { %4755 = vst [vmem:[#allocation11_spill] sm:$0xff] %v3602_v8  ;;  %v3612_v17 = vsub.f32 %v275_v37, %v324_v46  ;;  %v3620_v21 = vsub.f32 %v278_v39, %v326_v49  ;;  %v3622_v22 = vsub.f32 %v280_v40, %v330_v50  ;;  %v336_v26 = vand.u32 4294901760, %v281_v5  ;;  %v3637_v37 = vld [vmem:[%s3520_s24 + $0xe8] sm:$0xff] }
  0x21   : > { %2901 = vmatpush1.bf16.msra.mxu0 %v3565_v44  ;;  %v340_v27 = vand.u32 4294901760, %v283_v6  ;;  %v3625_v25 = vpack.c.bf16 %v332_v4, %v328_v3  ;;  %v3627_v28 = vsub.f32 %v277_v51, %v328_v3  ;;  %v342_v30 = vand.u32 4294901760, %v286_v11 }
  0x22   : > { %2903 = vmatprep.subr.bf16.mxu0 %v3570_v48  ;;  %v346_v31 = vand.u32 4294901760, %v288_v13  ;;  %v3630_v32 = vsub.f32 %v279_v52, %v332_v4  ;;  %v3632_v33 = vpack.c.bf16 %v338_v10, %v334_v9  ;;  %v3639_v39 = vsub.f32 %v282_v57, %v334_v9  ;;  %v3655_v52 = vld [vmem:[%s3520_s24 + $0xe0] sm:$0xff]  ;;  %v3663_v4 = vld [vmem:[%s3520_s24 + $0xf0] sm:$0xff] }
  0x23   : > { %4756 = vst [vmem:[#allocation12_spill] sm:$0xff] %v3625_v25  ;;  %v3641_v40 = vsub.f32 %v284_v58, %v338_v10  ;;  %v4695_v45 = vand.u32 4294901760, %v3562_v43  ;;  %v4696_v46 = vand.u32 4294901760, %v3567_v47  ;;  %v3648_v49 = vpack.c.bf16 %v340_v27, %v336_v26 }
  0x24   : > { %4757 = vst [vmem:[#allocation13_spill] sm:$0xff] %v3632_v33  ;;  %v3650_v50 = vsub.f32 %v281_v5, %v336_v26  ;;  %v3652_v51 = vsub.f32 %v283_v6, %v340_v27  ;;  %v3659_v57 = vpack.c.bf16 %v346_v31, %v342_v30  ;;  %v350_v58 = vand.u32 4294901760, %v3637_v37 }
  0x25   : > { %2905 = vmatpush1.bf16.msra.mxu0 %v3595_v0  ;;  %4758 = vst [vmem:[#allocation14_spill] sm:$0xff] %v3648_v49  ;;  %v405_v9 = vsub.f32 %v3562_v43, %v4695_v45  ;;  %v417_v5 = vsub.f32 %v3567_v47, %v4696_v46  ;;  %v4701_v26 = vand.u32 4294901760, %v3578_v55  ;;  %v3676_v29 = vsub.f32 %v286_v11, %v342_v30 }
  0x26   : > { %2907 = vmatprep.subr.bf16.mxu0 %v3602_v8  ;;  %4759 = vst [vmem:[#allocation15_spill] sm:$0xff] %v3659_v57  ;;  %v4760_v6 = vand.u32 4294901760, %v3574_v53  ;;  %v4761_v27 = vand.u32 4294901760, %v3615_v18  ;;  %v4762_v11 = vand.u32 4294901760, %v3618_v20  ;;  %v4764_v1 = vand.u32 4294901760, %v3576_v54 }
  0x27   : > { %v406_v35 = vand.u32 4294901760, %v405_v9  ;;  %v418_v3 = vand.u32 4294901760, %v417_v5  ;;  %v429_v9 = vsub.f32 %v3578_v55, %v4701_v26  ;;  %v4765_v5 = vand.u32 4294901760, %v3580_v56 }
  0x28   : > { %v411_v10 = vsub.f32 %v3574_v53, %v4760_v6  ;;  %v3690_v30 = vpack.c.bf16 %v4762_v11, %v4761_v27  ;;  %v423_v36 = vsub.f32 %v3576_v54, %v4764_v1  ;;  %v4766_v46 = vand.u32 4294901760, %v3644_v41 }
  0x29   : > { %2909 = vmatpush1.bf16.msra.mxu0 %v3625_v25  ;;  %v441_v6 = vsub.f32 %v3580_v56, %v4765_v5  ;;  %v4768_v27 = vand.u32 4294901760, %v3584_v59  ;;  %v395_v26 = vand.u32 4294901760, %v3560_v42  ;;  %v4770_v5 = vand.u32 4294901760, %v3586_v60 }
  0x2a   : > { %2911 = vmatprep.subr.bf16.mxu0 %v3632_v33  ;;  %4763 = vst [vmem:[#allocation16_spill] sm:$0xff] %v3690_v30  ;;  %v3704_v45 = vpack.c.bf16 %v4766_v46, %v350_v58  ;;  %v3711_v33 = vsub.f32 %v288_v13, %v346_v31  ;;  %v4771_v46 = vand.u32 4294901760, %v3655_v52  ;;  %v4772_v8 = vand.u32 4294901760, %v3663_v4 }
  0x2b   : > { %v435_v11 = vsub.f32 %v3584_v59, %v4768_v27  ;;  %v2922_v27 = vpack.c.bf16 %v418_v3, %v406_v35  ;;  %v412_v1 = vand.u32 4294901760, %v411_v10  ;;  %v424_v13 = vand.u32 4294901760, %v423_v36 }
  0x2c   : > { %4767 = vst [vmem:[#allocation17_spill] sm:$0xff] %v3704_v45  ;;  %4769 = vst [vmem:[#allocation18_spill] sm:$0xff] %v3711_v33  ;;  %v3722_v0 = vpack.c.bf16 %v4772_v8, %v4771_v46  ;;  %v430_v42 = vand.u32 4294901760, %v429_v9  ;;  %v442_v31 = vand.u32 4294901760, %v441_v6  ;;  %v4717_v48 = vand.u32 4294901760, %v3606_v14 }
  0x2d   : > { %2913 = vmatpush1.bf16.msra.mxu0 %v3648_v49  ;;  %v4716_v49 = vand.u32 4294901760, %v3599_v7  ;;  %v4774_v25 = vand.u32 4294901760, %v3588_v61  ;;  %v4775_v8 = vand.u32 4294901760, %v3590_v62  ;;  %v4720_v3 = vand.u32 4294901760, %v3608_v15 }
  0x2e   : > { %2915 = vmatprep.subr.bf16.mxu0 %v3659_v57  ;;  %v447_v57 = vsub.f32 %v3586_v60, %v4770_v5  ;;  %4773 = vst [vmem:[#allocation19_spill] sm:$0xff] %v3722_v0  ;;  %v436_v5 = vand.u32 4294901760, %v435_v11  ;;  %v4776_v36 = vand.u32 4294901760, %v3593_v63  ;;  %v4780_v24 = vand.u32 4294901760, %v3610_v16 }
  0x2f   : > { %v453_v44 = vsub.f32 %v3588_v61, %v4774_v25  ;;  %v465_v35 = vsub.f32 %v3590_v62, %v4775_v8  ;;  %v471_v6 = vsub.f32 %v3599_v7, %v4716_v49  ;;  %v477_v25 = vsub.f32 %v3606_v14, %v4717_v48 }
  0x30   : > { %v448_v10 = vand.u32 4294901760, %v447_v57  ;;  %v459_v9 = vsub.f32 %v3593_v63, %v4776_v36  ;;  %v489_v46 = vsub.f32 %v3608_v15, %v4720_v3  ;;  %v4777_v36 = vand.u32 4294901760, %v3615_v18 }
  0x31   : > { %2917 = vmatpush1.bf16.msra.mxu0 %v3690_v30  ;;  %v4778_v49 = vand.u32 4294901760, %v3618_v20  ;;  %v2924_v48 = vpack.c.bf16 %v424_v13, %v412_v1  ;;  %v4729_v30 = vand.u32 4294901760, %v3622_v22  ;;  %v3763_v3 = vsub.f32 %v3637_v37, %v350_v58 }
  0x32   : > { %2919 = vmatprep.subr.bf16.mxu0 %v3704_v45  ;;  %v3753_v45 = vsub.f32 %v3615_v18, %v4777_v36  ;;  %v2926_v8 = vpack.c.bf16 %v442_v31, %v430_v42  ;;  %v454_v57 = vand.u32 4294901760, %v453_v44  ;;  %v466_v38 = vand.u32 4294901760, %v465_v35 }
  0x33   : > { %v3758_v11 = vsub.f32 %v3618_v20, %v4778_v49  ;;  %4779 = vst [vmem:[#allocation20_spill] sm:$0xff] %v3763_v3  ;;  %v2928_v34 = vpack.c.bf16 %v448_v10, %v436_v5  ;;  %v460_v18 = vand.u32 4294901760, %v459_v9  ;;  %v472_v36 = vand.u32 4294901760, %v471_v6 }
  0x34   : > { %v483_v20 = vsub.f32 %v3610_v16, %v4780_v24  ;;  %v478_v49 = vand.u32 4294901760, %v477_v25  ;;  %v4781_v1 = vand.u32 4294901760, %v3612_v17  ;;  %v4782_v37 = vand.u32 4294901760, %v3620_v21 }
  0x35   : > { %2921 = vmatpush1.bf16.msra.mxu0 %v3722_v0  ;;  %v490_v0 = vand.u32 4294901760, %v489_v46  ;;  %v513_v44 = vsub.f32 %v3622_v22, %v4729_v30  ;;  %v4735_v24 = vand.u32 4294901760, %v3630_v32  ;;  %v4783_v42 = vmov 0.0  }
  0x36   : > { %2923 = vmatprep.subr.bf16.mxu0 %v2922_v27  ;;  %v495_v13 = vsub.f32 %v3612_v17, %v4781_v1  ;;  %v501_v58 = vsub.f32 %v3620_v21, %v4782_v37  ;;  %v4736_v27 = vand.u32 4294901760, %v3627_v28  ;;  %v2930_v31 = vpack.c.bf16 %v466_v38, %v454_v57 }
  0x37   : > { %v4732_v5 = vand.u32 4294901760, %v3641_v40  ;;  %v4730_v35 = vand.u32 4294901760, %v3650_v50  ;;  %v4784_v10 = vand.u32 4294901760, %v3644_v41  ;;  %v2932_v6 = vpack.c.bf16 %v472_v36, %v460_v18 }
  0x38   : > { %396 = vmatmul.mubr.f32.vlgmr.msra.gmra.mrb[0].mxu0 %v395_v26  ;;  %v4734_v26 = vand.u32 4294901760, %v3639_v39  ;;  %v484_v25 = vand.u32 4294901760, %v483_v20  ;;  %v4733_v46 = vand.u32 4294901760, %v3676_v29  ;;  %v2934_v1 = vpack.c.bf16 %v490_v0, %v478_v49 }
  0x39   : > { %2925 = vmatpush1.bf16.msra.mxu0 %v2924_v48  ;;  %626 = vmatprep.mubr.f32.mxu0 %v4783_v42  ;;  %v4731_v48 = vand.u32 4294901760, %v3652_v51  ;;  %v3787_v9 = vsub.f32 %v3644_v41, %v4784_v10  ;;  %v496_v37 = vand.u32 4294901760, %v495_v13  ;;  %v502_v30 = vand.u32 4294901760, %v501_v58 }
  0x3a   : > { %2927 = vmatprep.subr.bf16.mxu0 %v2926_v8  ;;  %v560_v38 = vand.u32 4294901760, %v3711_v33  ;;  %v514_v57 = vand.u32 4294901760, %v513_v44  ;;  %v507_v8 = vsub.f32 %v3627_v28, %v4736_v27  ;;  %v519_v41 = vsub.f32 %v3630_v32, %v4735_v24 }
  0x3b   : > { %4785 = vst [vmem:[#allocation21_spill] sm:$0xff] %v3787_v9  ;;  %v525_v18 = vsub.f32 %v3639_v39, %v4734_v26  ;;  %v537_v0 = vsub.f32 %v3641_v40, %v4732_v5  ;;  %v543_v36 = vsub.f32 %v3652_v51, %v4731_v48  ;;  %v549_v20 = vsub.f32 %v3676_v29, %v4733_v46 }
  0x3c   : > { %v4786_v49 = vand.u32 4294901760, %v3655_v52  ;;  %v561_v58 = vsub.f32 %v3711_v33, %v560_v38  ;;  %v554_v44 = vand.u32 4294901760, %v3753_v45  ;;  %v4787_v10 = vand.u32 4294901760, %v3663_v4 }
  0x3d   : > { %2929 = vmatpush1.bf16.msra.mxu0 %v2928_v34  ;;  %v531_v34 = vsub.f32 %v3650_v50, %v4730_v35  ;;  %v2936_v48 = vpack.c.bf16 %v496_v37, %v484_v25  ;;  %v572_v5 = vand.u32 4294901760, %v3763_v3  ;;  %v584_v46 = vand.u32 4294901760, %v3787_v9 }
  0x3e   : > { %2931 = vmatprep.subr.bf16.mxu0 %v2930_v31  ;;  %v3815_v13 = vsub.f32 %v3655_v52, %v4786_v49  ;;  %v566_v31 = vand.u32 4294901760, %v3758_v11  ;;  %v3823_v35 = vsub.f32 %v3663_v4, %v4787_v10  ;;  %v2938_v26 = vpack.c.bf16 %v514_v57, %v502_v30 }
  0x3f   : > { %v508_v52 = vand.u32 4294901760, %v507_v8  ;;  %v520_v49 = vand.u32 4294901760, %v519_v41  ;;  %v526_v24 = vand.u32 4294901760, %v525_v18  ;;  %v538_v27 = vand.u32 4294901760, %v537_v0 }
  0x40   : > { %v532_v23 = vand.u32 4294901760, %v531_v34  ;;  %v544_v12 = vand.u32 4294901760, %v543_v36  ;;  %v550_v19 = vand.u32 4294901760, %v549_v20  ;;  %v562_v33 = vand.u32 4294901760, %v561_v58 }
  0x41   : > { %2933 = vmatpush1.bf16.msra.mxu0 %v2932_v6  ;;  %v555_v42 = vsub.f32 %v3753_v45, %v554_v44  ;;  %v567_v4 = vsub.f32 %v3758_v11, %v566_v31  ;;  %v578_v25 = vand.u32 4294901760, %v3815_v13  ;;  %v573_v37 = vsub.f32 %v3763_v3, %v572_v5 }
  0x42   : > { %2935 = vmatprep.subr.bf16.mxu0 %v2934_v1  ;;  %v585_v6 = vsub.f32 %v3787_v9, %v584_v46  ;;  %v590_v30 = vand.u32 4294901760, %v3823_v35  ;;  %v2940_v57 = vpack.c.bf16 %v520_v49, %v508_v52  ;;  %v2942_v1 = vpack.c.bf16 %v538_v27, %v526_v24 }
  0x43   : > { %v2944_v8 = vpack.c.bf16 %v544_v12, %v532_v23  ;;  %v2946_v41 = vpack.c.bf16 %v562_v33, %v550_v19  ;;  %v556_v18 = vand.u32 4294901760, %v555_v42  ;;  %v568_v0 = vand.u32 4294901760, %v567_v4 }
  0x44   : > { %v579_v34 = vsub.f32 %v3815_v13, %v578_v25  ;;  %v574_v36 = vand.u32 4294901760, %v573_v37  ;;  %v586_v20 = vand.u32 4294901760, %v585_v6  ;;  %v591_v58 = vsub.f32 %v3823_v35, %v590_v30 }
  0x45   : > { %2937 = vmatpush1.bf16.msra.mxu0 %v2936_v48  ;;  %v4788_v10 = vand.u32 4294901760, %v3562_v43  ;;  %v4789_v9 = vand.u32 4294901760, %v3567_v47  ;;  %v4791_v12 = vand.u32 4294901760, %v3576_v54  ;;  %v4792_v23 = vand.u32 4294901760, %v3578_v55 }
  0x46   : > { %2939 = vmatprep.subr.bf16.mxu0 %v2938_v26  ;;  %v4790_v26 = vand.u32 4294901760, %v3574_v53  ;;  %v4793_v33 = vand.u32 4294901760, %v3580_v56  ;;  %v4794_v24 = vand.u32 4294901760, %v3584_v59  ;;  %v4795_v42 = vand.u32 4294901760, %v3586_v60 }
  0x47   : > { %v3839_v3 = vpack.c.bf16 %v4789_v9, %v4788_v10  ;;  %v4796_v9 = vand.u32 4294901760, %v3588_v61  ;;  %v4797_v52 = vand.u32 4294901760, %v3590_v62  ;;  %v4798_v4 = vand.u32 4294901760, %v3593_v63 }
  0x48   : > { %v3845_v19 = vpack.c.bf16 %v4791_v12, %v4790_v26  ;;  %v3851_v27 = vpack.c.bf16 %v4793_v33, %v4792_v23  ;;  %v3857_v48 = vpack.c.bf16 %v4795_v42, %v4794_v24  ;;  %v4799_v37 = vand.u32 4294901760, %v3599_v7 }
  0x49   : > { %2941 = vmatpush1.bf16.msra.mxu0 %v2940_v57  ;;  %v3863_v49 = vpack.c.bf16 %v4797_v52, %v4796_v9  ;;  %v4800_v57 = vand.u32 4294901760, %v3606_v14  ;;  %v4801_v10 = vand.u32 4294901760, %v3608_v15  ;;  %v4803_v12 = vand.u32 4294901760, %v3610_v16 }
  0x4a   : > { %2943 = vmatprep.subr.bf16.mxu0 %v2942_v1  ;;  %v3869_v6 = vpack.c.bf16 %v4799_v37, %v4798_v4  ;;  %v4804_v23 = vand.u32 4294901760, %v3612_v17  ;;  %v4806_v1 = vand.u32 4294901760, %v3620_v21  ;;  %v4807_v24 = vand.u32 4294901760, %v3622_v22 }
  0x4b   : > { %v3875_v26 = vpack.c.bf16 %v4801_v10, %v4800_v57  ;;  %v4809_v9 = vand.u32 4294901760, %v3627_v28  ;;  %v4810_v52 = vand.u32 4294901760, %v3630_v32  ;;  %v4812_v37 = vand.u32 4294901760, %v3639_v39 }
  0x4c   : > { %v3881_v33 = vpack.c.bf16 %v4804_v23, %v4803_v12  ;;  %v3887_v42 = vpack.c.bf16 %v4807_v24, %v4806_v1  ;;  %v4813_v57 = vand.u32 4294901760, %v3641_v40  ;;  %v4815_v12 = vand.u32 4294901760, %v3650_v50 }
  0x4d   : > { %4802 = vst [vmem:[#allocation22_spill] sm:$0xff] %v3875_v26  ;;  %v3893_v4 = vpack.c.bf16 %v4810_v52, %v4809_v9  ;;  %v4816_v23 = vand.u32 4294901760, %v3652_v51  ;;  %v4817_v1 = vand.u32 4294901760, %v3676_v29  ;;  %v3913_v9 = vpack.c.bf16 %v584_v46, %v572_v5  ;;  %2945 = vmatpush1.bf16.msra.mxu0 %v2944_v8 }
  0x4e   : > { %4805 = vst [vmem:[#allocation23_spill] sm:$0xff] %v3881_v33  ;;  %4808 = vst [vmem:[#allocation24_spill] sm:$0xff] %v3887_v42  ;;  %v3899_v10 = vpack.c.bf16 %v4813_v57, %v4812_v37  ;;  %v3911_v42 = vpack.c.bf16 %v566_v31, %v554_v44  ;;  %v3915_v52 = vpack.c.bf16 %v590_v30, %v578_v25  ;;  %v580_v37 = vand.u32 4294901760, %v579_v34  ;;  %v4836_v31 = vld [vmem:[#allocation16_spill] sm:$0xff]  ;;  %v4837_v25 = vld [vmem:[#allocation17_spill] sm:$0xff] }
  0x4f   : > { %4811 = vst [vmem:[#allocation25_spill] sm:$0xff] %v3893_v4  ;;  %v3905_v33 = vpack.c.bf16 %v4816_v23, %v4815_v12  ;;  %v3909_v24 = vpack.c.bf16 %v560_v38, %v4817_v1  ;;  %v2948_v4 = vpack.c.bf16 %v568_v0, %v556_v18  ;;  %v592_v57 = vand.u32 4294901760, %v591_v58  ;;  %2947 = vmatprep.subr.bf16.mxu0 %v2946_v41  ;;  %v4838_v30 = vld [vmem:[#allocation19_spill] sm:$0xff]  ;;  %v1158_v1 = vld [vmem:[%s4689_s2 + $0x38] sm:$0xff] }
  0x50   : > { %4814 = vst [vmem:[#allocation26_spill] sm:$0xff] %v3899_v10  ;;  %v2950_v10 = vpack.c.bf16 %v586_v20, %v574_v36  ;;  %v2954_v12 = vpack.c.bf16 %v3567_v47, %v3562_v43  ;;  %v2956_v38 = vpack.c.bf16 %v3576_v54, %v3574_v53  ;;  %v2958_v5 = vpack.c.bf16 %v3580_v56, %v3578_v55  ;;  %v1151_v36 = vld [vmem:[%s4689_s2] sm:$0xff] }
  0x51   : > { %2949 = vmatpush1.bf16.msra.mxu0 %v2948_v4  ;;  %v2952_v26 = vpack.c.bf16 %v592_v57, %v580_v37  ;;  %v2960_v46 = vpack.c.bf16 %v3586_v60, %v3584_v59  ;;  %v4818_v44 = vmov 0.0   ;;  %v2962_v43 = vpack.c.bf16 %v3590_v62, %v3588_v61  ;;  %v4819_v61 = vld [vmem:[#allocation18_spill] sm:$0xff] }
  0x52   : > { %2951 = vmatprep.subr.bf16.mxu0 %v2950_v10  ;;  %v2964_v47 = vpack.c.bf16 %v3599_v7, %v3593_v63  ;;  %v2966_v53 = vpack.c.bf16 %v3608_v15, %v3606_v14  ;;  %v2968_v54 = vpack.c.bf16 %v3612_v17, %v3610_v16  ;;  %v2970_v55 = vpack.c.bf16 %v3622_v22, %v3620_v21  ;;  %v4820_v7 = vld [vmem:[#allocation20_spill] sm:$0xff]  ;;  %v4821_v14 = vld [vmem:[#allocation21_spill] sm:$0xff]  ;;  %v4822_v17 = vld [vmem:[#allocation3_spill] sm:$0xff] }
  0x53   : > { %v2972_v56 = vpack.c.bf16 %v3630_v32, %v3627_v28  ;;  %v2974_v59 = vpack.c.bf16 %v3641_v40, %v3639_v39  ;;  %v2976_v60 = vpack.c.bf16 %v3652_v51, %v3650_v50  ;;  %v2978_v62 = vpack.c.bf16 %v4819_v61, %v3676_v29  ;;  %v4823_v21 = vld [vmem:[#allocation2_spill] sm:$0xff]  ;;  %v4824_v22 = vld [vmem:[#allocation4_spill] sm:$0xff]  ;;  %v4825_v29 = vld [vmem:[#allocation5_spill] sm:$0xff] }
  0x54   : > { %v2980_v63 = vpack.c.bf16 %v3758_v11, %v3753_v45  ;;  %v2982_v15 = vpack.c.bf16 %v4821_v14, %v4820_v7  ;;  %v2984_v16 = vpack.c.bf16 %v3823_v35, %v3815_v13  ;;  %v4826_v28 = vld [vmem:[#allocation6_spill] sm:$0xff]  ;;  %v4827_v32 = vld [vmem:[#allocation7_spill] sm:$0xff]  ;;  %v4828_v39 = vld [vmem:[#allocation8_spill] sm:$0xff]  ;;  %v4839_v8 = vand.u32 4294901760, %v4823_v21 }
  0x55   : > { %2953 = vmatpush1.bf16.msra.mxu0 %v2952_v26  ;;  %v4829_v40 = vld [vmem:[#allocation9_spill] sm:$0xff]  ;;  %v4830_v45 = vld [vmem:[#allocation10_spill] sm:$0xff]  ;;  %v4831_v50 = vld [vmem:[#allocation11_spill] sm:$0xff]  ;;  %v1169_v20 = vsel %vm1167_vm0, %v1151_v36, 0  ;;  %v4042_v37 = vsel %vm1167_vm0, %v1158_v1, 0 }
  0x56   : > { %2955 = vmatprep.subr.bf16.mxu0 %v2954_v12  ;;  %v4832_v51 = vld [vmem:[#allocation12_spill] sm:$0xff]  ;;  %v4833_v11 = vld [vmem:[#allocation13_spill] sm:$0xff]  ;;  %v4834_v35 = vld [vmem:[#allocation14_spill] sm:$0xff]  ;;  %v4012_v58 = vand.u32 4294901760, %v1169_v20 }
  0x57   : > { %v4835_v13 = vld [vmem:[#allocation15_spill] sm:$0xff]  ;;  %v4840_v41 = vld [vmem:[#allocation22_spill] sm:$0xff]  ;;  %v4843_v0 = vld [vmem:[#allocation25_spill] sm:$0xff] }
  0x58   : > { %628 = vmatmul.mubr.f32.vlgmr.msra.gmra.mrb[0].mxu0 %v3512_v2  ;;  %v4841_v18 = vld [vmem:[#allocation23_spill] sm:$0xff]  ;;  %v4844_v34 = vld [vmem:[#allocation26_spill] sm:$0xff] }
  0x59   : > { %2957 = vmatpush1.bf16.msra.mxu0 %v2956_v38  ;;  %762 = vmatprep.mubr.f32.mxu0 %v4818_v44  ;;  %v1159_v12 = vld [vmem:[%s4689_s2 + $0x40] sm:$0xff]  ;;  %v1152_v38 = vld [vmem:[%s4689_s2 + $0x8] sm:$0xff] }
  0x5a   : > { %2959 = vmatprep.subr.bf16.mxu0 %v2958_v5 }
  0x5d   : > { %2961 = vmatpush1.bf16.msra.mxu0 %v2960_v46  ;;  %v4055_v46 = vand.u32 4294901760, %v4042_v37 }
  0x5e   : > { %2963 = vmatprep.subr.bf16.mxu0 %v2962_v43 }
  0x61   : > { %2965 = vmatpush1.bf16.msra.mxu0 %v2964_v47  ;;  %v4058_v47 = vsel %vm1167_vm0, %v1159_v12, 0 }
  0x62   : > { %2967 = vmatprep.subr.bf16.mxu0 %v2966_v53  ;;  %v1172_v53 = vsel %vm1167_vm0, %v1152_v38, 0 }
  0x65   : > { %2969 = vmatpush1.bf16.msra.mxu0 %v2968_v54  ;;  %v1160_v54 = vld [vmem:[%s4689_s2 + $0x48] sm:$0xff] }
  0x66   : > { %2971 = vmatprep.subr.bf16.mxu0 %v2970_v55  ;;  %v1153_v55 = vld [vmem:[%s4689_s2 + $0x10] sm:$0xff] }
  0x67   : > { %v1175_v61 = vsel %vm1167_vm0, %v1153_v55, 0 }
  0x69   : > { %2973 = vmatpush1.bf16.msra.mxu0 %v2972_v56  ;;  %v4070_v56 = vand.u32 4294901760, %v4058_v47 }
  0x6a   : > { %2975 = vmatprep.subr.bf16.mxu0 %v2974_v59  ;;  %v4072_v59 = vand.u32 4294901760, %v1172_v53 }
  0x6c   : > { %v4092_v14 = vsub.f32 %v1172_v53, %v4072_v59  ;;  %v1166_v53 = vld [vmem:[%s4689_s2 + $0x78] sm:$0xff] }
  0x6d   : > { %2977 = vmatpush1.bf16.msra.mxu0 %v2976_v60  ;;  %v4077_v60 = vsel %vm1167_vm0, %v1160_v54, 0 }
  0x6e   : > { %2979 = vmatprep.subr.bf16.mxu0 %v2978_v62  ;;  %v1161_v62 = vld [vmem:[%s4689_s2 + $0x50] sm:$0xff]  ;;  %v4089_v7 = vand.u32 4294901760, %v4077_v60 }
  0x71   : > { %2981 = vmatpush1.bf16.msra.mxu0 %v2980_v63  ;;  %v1154_v63 = vld [vmem:[%s4689_s2 + $0x18] sm:$0xff] }
  0x72   : > { %2983 = vmatprep.subr.bf16.mxu0 %v2982_v15  ;;  %v4094_v15 = vand.u32 4294901760, %v1175_v61 }
  0x75   : > { %2985 = vmatpush1.bf16.msra.mxu0 %v2984_v16  ;;  %v4098_v16 = vsel %vm1167_vm0, %v1161_v62, 0 }
  0x76   : > { %2987 = vmatprep.subr.bf16.mxu0 %v4822_v17 }
  0x78   : > { %765 = vmatmul.mubr.f32.vlgmr.msra.gmra.mrb[0].mxu0 %v4823_v21  ;;  %v1162_v21 = vld [vmem:[%s4689_s2 + $0x58] sm:$0xff] }
  0x79   : > { %2989 = vmatpush1.bf16.msra.mxu0 %v4824_v22  ;;  %867 = vmatprep.mubr.f32.mxu0 %v4818_v44 }
  0x7a   : > { %2991 = vmatprep.subr.bf16.mxu0 %v4825_v29 }
  0x7d   : > { %2993 = vmatpush1.bf16.msra.mxu0 %v4826_v28 }
  0x7e   : > { %2995 = vmatprep.subr.bf16.mxu0 %v4827_v32 }
  0x81   : > { %2997 = vmatpush1.bf16.msra.mxu0 %v4828_v39 }
  0x82   : > { %2999 = vmatprep.subr.bf16.mxu0 %v4829_v40 }
  0x85   : > { %3001 = vmatpush1.bf16.msra.mxu0 %v4830_v45 }
  0x86   : > { %3003 = vmatprep.subr.bf16.mxu0 %v4831_v50 }
  0x89   : > { %3005 = vmatpush1.bf16.msra.mxu0 %v4832_v51 }
  0x8a   : > { %3007 = vmatprep.subr.bf16.mxu0 %v4833_v11 }
  0x8d   : > { %3009 = vmatpush1.bf16.msra.mxu0 %v4834_v35 }
  0x8e   : > { %3011 = vmatprep.subr.bf16.mxu0 %v4835_v13 }
  0x91   : > { %3013 = vmatpush1.bf16.msra.mxu0 %v4836_v31 }
  0x92   : > { %3015 = vmatprep.subr.bf16.mxu0 %v4837_v25 }
  0x95   : > { %3017 = vmatpush1.bf16.msra.mxu0 %v4838_v30 }
  0x96   : > { %3019 = vmatprep.subr.bf16.mxu0 %v3839_v3  ;;  %v4842_v3 = vld [vmem:[#allocation24_spill] sm:$0xff] }
  0x98   : > { %871 = vmatmul.mubr.f32.vlgmr.msra.gmra.mrb[0].mxu0 %v4839_v8 }
  0x99   : > { %3021 = vmatpush1.bf16.msra.mxu0 %v3845_v19  ;;  %1037 = vmatprep.mubr.f32.mxu0 %v4818_v44  ;;  %v4015_v19 = vsub.f32 %v1169_v20, %v4012_v58 }
  0x9a   : > { %3023 = vmatprep.subr.bf16.mxu0 %v3851_v27 }
  0x9b   : > { %v1285_v27 = vand.u32 4294901760, %v4015_v19 }
  0x9d   : > { %3025 = vmatpush1.bf16.msra.mxu0 %v3857_v48 }
  0x9e   : > { %3027 = vmatprep.subr.bf16.mxu0 %v3863_v49 }
  0xa1   : > { %3029 = vmatpush1.bf16.msra.mxu0 %v3869_v6 }
  0xa2   : > { %3031 = vmatprep.subr.bf16.mxu0 %v4840_v41 }
  0xa5   : > { %3033 = vmatpush1.bf16.msra.mxu0 %v4841_v18 }
  0xa6   : > { %3035 = vmatprep.subr.bf16.mxu0 %v4842_v3  ;;  %v1164_v3 = vld [vmem:[%s4689_s2 + $0x68] sm:$0xff] }
  0xa9   : > { %3037 = vmatpush1.bf16.msra.mxu0 %v4843_v0  ;;  %v1157_v0 = vld [vmem:[%s4689_s2 + $0x30] sm:$0xff] }
  0xaa   : > { %3039 = vmatprep.subr.bf16.mxu0 %v4844_v34 }
  0xad   : > { %3041 = vmatpush1.bf16.msra.mxu0 %v3905_v33 }
  0xae   : > { %3043 = vmatprep.subr.bf16.mxu0 %v3909_v24 }
  0xb1   : > { %3045 = vmatpush1.bf16.msra.mxu0 %v3911_v42 }
  0xb2   : > { %3047 = vmatprep.subr.bf16.mxu0 %v3913_v9 }
  0xb5   : > { %3049 = vmatpush1.bf16.msra.mxu0 %v3915_v52 }
  0xb6   : > { %3051 = vmatprep.subr.bf16.mxu0 %v4822_v17  ;;  %v1178_v17 = vsel %vm1167_vm0, %v1154_v63, 0 }
  0xb8   : > { %1039 = vmatmul.mubr.f32.vlgmr.msra.gmra.mrb[0].mxu0 %v3512_v2 }
  0xb9   : > { %3053 = vmatpush1.bf16.msra.mxu0 %v4824_v22  ;;  %1141 = vmatprep.mubr.f32.mxu0 %v4818_v44  ;;  %v1155_v22 = vld [vmem:[%s4689_s2 + $0x20] sm:$0xff] }
  0xba   : > { %3055 = vmatprep.subr.bf16.mxu0 %v4825_v29  ;;  %v1296_v29 = vand.u32 4294901760, %v4092_v14 }
  0xbd   : > { %3057 = vmatpush1.bf16.msra.mxu0 %v4826_v28  ;;  %v4110_v28 = vand.u32 4294901760, %v4098_v16 }
  0xbe   : > { %3059 = vmatprep.subr.bf16.mxu0 %v4827_v32  ;;  %v4113_v32 = vsub.f32 %v1175_v61, %v4094_v15 }
  0xc1   : > { %3061 = vmatpush1.bf16.msra.mxu0 %v4828_v39  ;;  %v4115_v39 = vand.u32 4294901760, %v1178_v17 }
  0xc2   : > { %3063 = vmatprep.subr.bf16.mxu0 %v4829_v40  ;;  %v1297_v40 = vsub.f32 %v4092_v14, %v1296_v29 }
  0xc5   : > { %3065 = vmatpush1.bf16.msra.mxu0 %v4830_v45  ;;  %v4122_v45 = vsel %vm1167_vm0, %v1162_v21, 0 }
  0xc6   : > { %3067 = vmatprep.subr.bf16.mxu0 %v4831_v50  ;;  %v1181_v50 = vsel %vm1167_vm0, %v1155_v22, 0 }
  0xc9   : > { %3069 = vmatpush1.bf16.msra.mxu0 %v4832_v51  ;;  %v1163_v51 = vld [vmem:[%s4689_s2 + $0x60] sm:$0xff] }
  0xca   : > { %3071 = vmatprep.subr.bf16.mxu0 %v4833_v11  ;;  %v1156_v11 = vld [vmem:[%s4689_s2 + $0x28] sm:$0xff]  ;;  %v4146_v41 = vsel %vm1167_vm0, %v1163_v51, 0 }
  0xcb   : > { %v1184_v18 = vsel %vm1167_vm0, %v1156_v11, 0  ;;  %v4159_v20 = vand.u32 4294901760, %v4146_v41 }
  0xcd   : > { %3073 = vmatpush1.bf16.msra.mxu0 %v4834_v35  ;;  %v1307_v35 = vand.u32 4294901760, %v4113_v32 }
  0xce   : > { %3075 = vmatprep.subr.bf16.mxu0 %v4835_v13  ;;  %v1298_v13 = vand.u32 4294901760, %v1297_v40 }
  0xcf   : > { %v1308_v8 = vsub.f32 %v4113_v32, %v1307_v35 }
  0xd1   : > { %3077 = vmatpush1.bf16.msra.mxu0 %v4836_v31  ;;  %v4134_v31 = vand.u32 4294901760, %v4122_v45  ;;  %v1309_v36 = vand.u32 4294901760, %v1308_v8  ;;  %v4233_v8 = vsub.f32 %v4058_v47, %v4070_v56 }
  0xd2   : > { %3079 = vmatprep.subr.bf16.mxu0 %v4837_v25  ;;  %v4137_v25 = vsub.f32 %v1178_v17, %v4115_v39  ;;  %v4212_v17 = vsel %vm1167_vm0, %v1166_v53, 0  ;;  %v4280_v53 = vsub.f32 %v4146_v41, %v4159_v20 }
  0xd3   : > { %v4218_v40 = vand.u32 4294901760, %v4212_v17 }
  0xd4   : > { %v1318_v34 = vand.u32 4294901760, %v4137_v25 }
  0xd5   : > { %3081 = vmatpush1.bf16.msra.mxu0 %v4838_v30  ;;  %v4139_v30 = vand.u32 4294901760, %v1181_v50 }
  0xd8   : > { %1143 = vmatmul.mubr.f32.vlgmr.msra.gmra.mrb[0].mxu0 %v3512_v2  ;;  %v1286_v2 = vsub.f32 %v4015_v19, %v1285_v27 }
  0xd9   : > { %1282 = vmatprep.mubr.f32.mxu0 %v4818_v44 }
  0xda   : > { %v1287_v4 = vand.u32 4294901760, %v1286_v2  ;;  %v4164_v2 = vand.u32 4294901760, %v1184_v18 }
  0xdc   : > { %v4184_v12 = vsub.f32 %v1184_v18, %v4164_v2  ;;  %v1373_v18 = vand.u32 4294901760, %v4233_v8 }
  0xde   : > { %v1340_v54 = vand.u32 4294901760, %v4184_v12  ;;  %v1374_v47 = vsub.f32 %v4233_v8, %v1373_v18 }
  0xe0   : > { %v1341_v63 = vsub.f32 %v4184_v12, %v1340_v54 }
  0xe2   : > { %v1342_v22 = vand.u32 4294901760, %v1341_v63 }
 0x1ab   : > { %v1144_v48 = vpop.f32.mrb[0].mxu0 }
 0x1ac   : > { %v1149_v49 = vmax.f32 %v1144_v48, 0.0  ;;  %v1146_v6 = vpop.f32.mrb[1].mxu0  ;;  %v4162_v48 = vsub.f32 %v1181_v50, %v4139_v30  ;;  %v4222_v50 = vsub.f32 %v4042_v37, %v4055_v46 }
 0x1ad   : > { %v1150_v26 = vmax.f32 %v1146_v6, 0.0  ;;  %v4171_v6 = vsel %vm1167_vm0, %v1164_v3, 0 }
 0x1ae   : > { %v4021_v33 = vand.u32 4294901760, %v1149_v49  ;;  %v1329_v1 = vand.u32 4294901760, %v4162_v48  ;;  %v1362_v11 = vand.u32 4294901760, %v4222_v50 }
 0x1af   : > { %v4023_v42 = vand.u32 4294901760, %v1150_v26 }
 0x1b0   : > { %v4026_v10 = vsub.f32 %v1149_v49, %v4021_v33  ;;  %v1319_v49 = vsub.f32 %v4137_v25, %v1318_v34  ;;  %v1363_v37 = vsub.f32 %v4222_v50, %v1362_v11 }
 0x1b1   : > { %v4029_v23 = vsub.f32 %v1150_v26, %v4023_v42  ;;  %1217 = vmatprep.subr.mxu0 %v4023_v42  ;;  %v1187_v26 = vsel %vm1167_vm0, %v1157_v0, 0  ;;  %v4244_v0 = vsub.f32 %v4077_v60, %v4089_v7  ;;  %v4258_v60 = vsub.f32 %v4098_v16, %v4110_v28 }
 0x1b2   : > { %v1467_v24 = vand.u32 4294901760, %v4026_v10  ;;  %1219 = vmatpush1.msra.mxu0 %v4021_v33  ;;  %v4186_v38 = vand.u32 4294901760, %v1187_v26  ;;  %v1364_v3 = vand.u32 4294901760, %v1363_v37 }
 0x1b3   : > { %v1461_v9 = vand.u32 4294901760, %v4029_v23  ;;  %1288 = vmatmul.mubr.f32.vlgmr.msra.gmra.mrb[2].mxu0 %v1287_v4  ;;  %v1165_v4 = vld [vmem:[%s4689_s2 + $0x70] sm:$0xff] }
 0x1b4   : > { %v1468_v52 = vsub.f32 %v4026_v10, %v1467_v24  ;;  %1293 = vmatprep.mubr.f32.mxu0 %v4818_v44  ;;  %v4205_v62 = vsub.f32 %v1187_v26, %v4186_v38 }
 0x1b5   : > { %v1462_v57 = vsub.f32 %v4029_v23, %v1461_v9 }
 0x1b6   : > { %v1469_v43 = vand.u32 4294901760, %v1468_v52  ;;  %v1320_v52 = vand.u32 4294901760, %v1319_v49  ;;  %v1351_v21 = vand.u32 4294901760, %v4205_v62  ;;  %v1375_v49 = vand.u32 4294901760, %v1374_v47 }
 0x1b7   : > { %v1463_v5 = vand.u32 4294901760, %v1462_v57  ;;  %1299 = vmatmul.mubr.f32.gmra.mrb[4].mxu0 %v1298_v13  ;;  %v4181_v57 = vand.u32 4294901760, %v4171_v6 }
 0x1b8   : > { %1304 = vmatprep.mubr.f32.mxu0 %v4818_v44  ;;  %v1352_v51 = vsub.f32 %v4205_v62, %v1351_v21 }
 0x1b9   : > { %1464 = vmatprep.subr.mxu0 %v1463_v5  ;;  %3082 = vmatprep.subr.mxu1 %v1463_v5  ;;  %v1330_v5 = vsub.f32 %v4162_v48, %v1329_v1 }
 0x1ba   : > { %1470 = vmatpush1.msra.mxu0 %v1469_v43  ;;  %3083 = vmatpush1.msra.mxu1 %v1469_v43  ;;  %v4193_v43 = vsel %vm1167_vm0, %v1165_v4, 0  ;;  %v1353_v13 = vand.u32 4294901760, %v1352_v51  ;;  %v4269_v4 = vsub.f32 %v4122_v45, %v4134_v31 }
 0x1bb   : > { %1584 = vmatmul.mubr.f32.vlgmr.msra.gmra.mrb[0].mxu1 %v4055_v46  ;;  %1648 = vmatprep.subr.mxu1 %v4029_v23  ;;  %v1331_v55 = vand.u32 4294901760, %v1330_v5  ;;  %v4202_v61 = vand.u32 4294901760, %v4193_v43  ;;  %v1395_v23 = vand.u32 4294901760, %v4258_v60 }
 0x1bc   : > { %1651 = vmatpush1.msra.mxu1 %v4026_v10  ;;  %1589 = vmatprep.mubr.f32.mxu1 %v4818_v44 }
 0x1bd   : > { %1844 = vmatprep.subr.mxu1 %v4023_v42  ;;  %1310 = vmatmul.mubr.f32.gmra.mrb[6].mxu0 %v1309_v36  ;;  %v1384_v36 = vand.u32 4294901760, %v4244_v0  ;;  %v1396_v16 = vsub.f32 %v4258_v60, %v1395_v23  ;;  %v4302_v37 = vsub.f32 %v4193_v43, %v4202_v61 }
 0x1be   : > { %1315 = vmatprep.mubr.f32.mxu0 %v4818_v44 }
 0x1bf   : > { %1591 = vmatmul.mubr.f32.gmra.mrb[2].mxu1 %v4070_v56  ;;  %v1385_v26 = vsub.f32 %v4244_v0, %v1384_v36  ;;  %v1397_v5 = vand.u32 4294901760, %v1396_v16 }
 0x1c0   : > { %1596 = vmatprep.mubr.f32.mxu1 %v4818_v44 }
 0x1c1   : > { %1321 = vmatmul.mubr.f32.gmra.mrb[8].mxu0 %v1320_v52  ;;  %v1406_v52 = vand.u32 4294901760, %v4269_v4 }
 0x1c2   : > { %1326 = vmatprep.mubr.f32.mxu0 %v4818_v44 }
 0x1c3   : > { %1598 = vmatmul.mubr.f32.gmra.mrb[4].mxu1 %v4089_v7  ;;  %v1407_v45 = vsub.f32 %v4269_v4, %v1406_v52 }
 0x1c4   : > { %1603 = vmatprep.mubr.f32.mxu1 %v4818_v44 }
 0x1c5   : > { %1332 = vmatmul.mubr.f32.gmra.mrb[10].mxu0 %v1331_v55  ;;  %v1417_v55 = vand.u32 4294901760, %v4280_v53  ;;  %v1408_v63 = vand.u32 4294901760, %v1407_v45 }
 0x1c6   : > { %1337 = vmatprep.mubr.f32.mxu0 %v4818_v44 }
 0x1c7   : > { %1605 = vmatmul.mubr.f32.gmra.mrb[6].mxu1 %v4110_v28  ;;  %v1418_v41 = vsub.f32 %v4280_v53, %v1417_v55 }
 0x1c8   : > { %1610 = vmatprep.mubr.f32.mxu1 %v4818_v44 }
 0x1c9   : > { %1343 = vmatmul.mubr.f32.gmra.mrb[12].mxu0 %v1342_v22  ;;  %v4291_v22 = vsub.f32 %v4171_v6, %v4181_v57 }
 0x1ca   : > { %1348 = vmatprep.mubr.f32.mxu0 %v4818_v44 }
 0x1cb   : > { %1612 = vmatmul.mubr.f32.gmra.mrb[8].mxu1 %v4134_v31  ;;  %v1428_v51 = vand.u32 4294901760, %v4291_v22 }
 0x1cc   : > { %1617 = vmatprep.mubr.f32.mxu1 %v4818_v44 }
 0x1cd   : > { %1354 = vmatmul.mubr.f32.gmra.mrb[14].mxu0 %v1353_v13  ;;  %v1419_v13 = vand.u32 4294901760, %v1418_v41  ;;  %v1429_v6 = vsub.f32 %v4291_v22, %v1428_v51 }
 0x1ce   : > { %1359 = vmatprep.mubr.f32.mxu0 %v4818_v44 }
 0x1cf   : > { %1619 = vmatmul.mubr.f32.gmra.mrb[10].mxu1 %v4159_v20  ;;  %v1430_v47 = vand.u32 4294901760, %v1429_v6 }
 0x1d0   : > { %1624 = vmatprep.mubr.f32.mxu1 %v4818_v44 }
 0x1d1   : > { %1365 = vmatmul.mubr.f32.gmra.mrb[16].mxu0 %v1364_v3  ;;  %v1439_v3 = vand.u32 4294901760, %v4302_v37 }
 0x1d2   : > { %1370 = vmatprep.mubr.f32.mxu0 %v4818_v44 }
 0x1d3   : > { %1626 = vmatmul.mubr.f32.gmra.mrb[12].mxu1 %v4181_v57  ;;  %v1440_v43 = vsub.f32 %v4302_v37, %v1439_v3 }
 0x1d4   : > { %1631 = vmatprep.mubr.f32.mxu1 %v4818_v44 }
 0x1d5   : > { %1376 = vmatmul.mubr.f32.gmra.mrb[18].mxu0 %v1375_v49  ;;  %v4313_v49 = vsub.f32 %v4212_v17, %v4218_v40 }
 0x1d6   : > { %1381 = vmatprep.mubr.f32.mxu0 %v4818_v44 }
 0x1d7   : > { %1633 = vmatmul.mubr.f32.gmra.mrb[14].mxu1 %v4202_v61 }
 0x1d8   : > { %1638 = vmatprep.mubr.f32.mxu1 %v4818_v44 }
 0x1db   : > { %1640 = vmatmul.mubr.f32.gmra.mrb[16].mxu1 %v4218_v40 }
 0x1dc   : > { %1714 = vmatprep.mubr.f32.mxu1 %v4818_v44 }
 0x1df   : > { %1717 = vmatmul.mubr.f32.vlgmr.msra.gmra.mrb[18].mxu1 %v4015_v19 }
 0x1e0   : > { %1846 = vmatpush1.msra.mxu1 %v4021_v33  ;;  %1722 = vmatprep.mubr.f32.mxu1 %v4818_v44 }
 0x1e1   : > { %2057 = vmatprep.subr.mxu1 %v1461_v9  ;;  %v1386_v9 = vand.u32 4294901760, %v1385_v26  ;;  %v1450_v26 = vand.u32 4294901760, %v4313_v49 }
 0x1e3   : > { %1725 = vmatmul.mubr.f32.gmra.mrb[20].mxu1 %v4092_v14  ;;  %1387 = vmatmul.mubr.f32.gmra.mrb[20].mxu0 %v1386_v9  ;;  %v1441_v9 = vand.u32 4294901760, %v1440_v43  ;;  %v1451_v17 = vsub.f32 %v4313_v49, %v1450_v26 }
 0x1e4   : > { %1730 = vmatprep.mubr.f32.mxu1 %v4818_v44  ;;  %1392 = vmatprep.mubr.f32.mxu0 %v4818_v44 }
 0x1e5   : > { %v1452_v16 = vand.u32 4294901760, %v1451_v17 }
 0x1e7   : > { %1733 = vmatmul.mubr.f32.gmra.mrb[22].mxu1 %v4113_v32  ;;  %1398 = vmatmul.mubr.f32.gmra.mrb[22].mxu0 %v1397_v5 }
 0x1e8   : > { %1738 = vmatprep.mubr.f32.mxu1 %v4818_v44  ;;  %1403 = vmatprep.mubr.f32.mxu0 %v4818_v44 }
 0x1eb   : > { %1741 = vmatmul.mubr.f32.gmra.mrb[24].mxu1 %v4137_v25  ;;  %1409 = vmatmul.mubr.f32.gmra.mrb[24].mxu0 %v1408_v63 }
 0x1ec   : > { %1746 = vmatprep.mubr.f32.mxu1 %v4818_v44  ;;  %1414 = vmatprep.mubr.f32.mxu0 %v4818_v44 }
 0x1ef   : > { %1749 = vmatmul.mubr.f32.gmra.mrb[26].mxu1 %v4162_v48  ;;  %1420 = vmatmul.mubr.f32.gmra.mrb[26].mxu0 %v1419_v13 }
 0x1f0   : > { %1754 = vmatprep.mubr.f32.mxu1 %v4818_v44  ;;  %1425 = vmatprep.mubr.f32.mxu0 %v4818_v44 }
 0x1f3   : > { %1757 = vmatmul.mubr.f32.gmra.mrb[28].mxu1 %v4184_v12  ;;  %1431 = vmatmul.mubr.f32.gmra.mrb[28].mxu0 %v1430_v47 }
 0x1f4   : > { %1762 = vmatprep.mubr.f32.mxu1 %v4818_v44  ;;  %1436 = vmatprep.mubr.f32.mxu0 %v4818_v44 }
 0x1f7   : > { %1765 = vmatmul.mubr.f32.gmra.mrb[30].mxu1 %v4205_v62  ;;  %1442 = vmatmul.mubr.f32.gmra.mrb[30].mxu0 %v1441_v9 }
 0x1f8   : > { %1770 = vmatprep.mubr.f32.mxu1 %v4818_v44  ;;  %1447 = vmatprep.mubr.f32.mxu0 %v4818_v44 }
 0x1fb   : > { %1773 = vmatmul.mubr.f32.gmra.mrb[0].mxu1 %v4222_v50  ;;  %1453 = vmatmul.mubr.f32.gmra.mrb[32].mxu0 %v1452_v16 }
 0x1fc   : > { %1778 = vmatprep.mubr.f32.mxu1 %v4818_v44  ;;  %1533 = vmatprep.mubr.f32.mxu0 %v4818_v44 }
 0x1ff   : > { %1781 = vmatmul.mubr.f32.gmra.mrb[2].mxu1 %v4233_v8  ;;  %1535 = vmatmul.mubr.f32.vlgmr.msra.gmra.mrb[2].mxu0 %v4012_v58 }
 0x200   : > { %1786 = vmatprep.mubr.f32.mxu1 %v4818_v44  ;;  %1540 = vmatprep.mubr.f32.mxu0 %v4818_v44 }
 0x203   : > { %1789 = vmatmul.mubr.f32.gmra.mrb[4].mxu1 %v4244_v0  ;;  %1542 = vmatmul.mubr.f32.gmra.mrb[4].mxu0 %v4072_v59 }
 0x204   : > { %1794 = vmatprep.mubr.f32.mxu1 %v4818_v44  ;;  %1547 = vmatprep.mubr.f32.mxu0 %v4818_v44 }
 0x207   : > { %1797 = vmatmul.mubr.f32.gmra.mrb[6].mxu1 %v4258_v60  ;;  %1549 = vmatmul.mubr.f32.gmra.mrb[6].mxu0 %v4094_v15 }
 0x208   : > { %1802 = vmatprep.mubr.f32.mxu1 %v4818_v44  ;;  %1554 = vmatprep.mubr.f32.mxu0 %v4818_v44 }
 0x20b   : > { %1805 = vmatmul.mubr.f32.gmra.mrb[8].mxu1 %v4269_v4  ;;  %1556 = vmatmul.mubr.f32.gmra.mrb[8].mxu0 %v4115_v39 }
 0x20c   : > { %1810 = vmatprep.mubr.f32.mxu1 %v4818_v44  ;;  %1561 = vmatprep.mubr.f32.mxu0 %v4818_v44 }
 0x20f   : > { %1813 = vmatmul.mubr.f32.gmra.mrb[10].mxu1 %v4280_v53  ;;  %1563 = vmatmul.mubr.f32.gmra.mrb[10].mxu0 %v4139_v30 }
 0x210   : > { %1818 = vmatprep.mubr.f32.mxu1 %v4818_v44  ;;  %1568 = vmatprep.mubr.f32.mxu0 %v4818_v44 }
 0x213   : > { %1821 = vmatmul.mubr.f32.gmra.mrb[12].mxu1 %v4291_v22  ;;  %1570 = vmatmul.mubr.f32.gmra.mrb[12].mxu0 %v4164_v2 }
 0x214   : > { %1826 = vmatprep.mubr.f32.mxu1 %v4818_v44  ;;  %1575 = vmatprep.mubr.f32.mxu0 %v4818_v44 }
 0x217   : > { %1829 = vmatmul.mubr.f32.gmra.mrb[14].mxu1 %v4302_v37  ;;  %1577 = vmatmul.mubr.f32.gmra.mrb[14].mxu0 %v4186_v38 }
 0x218   : > { %1834 = vmatprep.mubr.f32.mxu1 %v4818_v44 }
 0x21b   : > { %1837 = vmatmul.mubr.f32.gmra.mrb[16].mxu1 %v4313_v49 }
 0x21c   : > { %1909 = vmatprep.mubr.f32.mxu1 %v4818_v44 }
 0x21f   : > { %1913 = vmatmul.mubr.f32.vlgmr.msra.gmra.mrb[18].mxu1 %v1285_v27 }
 0x220   : > { %2061 = vmatpush1.msra.mxu1 %v1467_v24  ;;  %1918 = vmatprep.mubr.f32.mxu1 %v4818_v44 }
 0x221   : > { %2238 = vmatprep.subr.mxu1 %v4023_v42 }
 0x223   : > { %1922 = vmatmul.mubr.f32.gmra.mrb[20].mxu1 %v1296_v29 }
 0x224   : > { %1927 = vmatprep.mubr.f32.mxu1 %v4818_v44 }
 0x227   : > { %1931 = vmatmul.mubr.f32.gmra.mrb[22].mxu1 %v1307_v35 }
 0x228   : > { %1936 = vmatprep.mubr.f32.mxu1 %v4818_v44 }
 0x22b   : > { %1940 = vmatmul.mubr.f32.gmra.mrb[24].mxu1 %v1318_v34 }
 0x22c   : > { %1945 = vmatprep.mubr.f32.mxu1 %v4818_v44 }
 0x22f   : > { %1949 = vmatmul.mubr.f32.gmra.mrb[26].mxu1 %v1329_v1 }
 0x230   : > { %1954 = vmatprep.mubr.f32.mxu1 %v4818_v44 }
 0x233   : > { %1958 = vmatmul.mubr.f32.gmra.mrb[28].mxu1 %v1340_v54 }
 0x234   : > { %1963 = vmatprep.mubr.f32.mxu1 %v4818_v44 }
 0x237   : > { %1967 = vmatmul.mubr.f32.gmra.mrb[30].mxu1 %v1351_v21 }
 0x238   : > { %1972 = vmatprep.mubr.f32.mxu1 %v4818_v44 }
 0x23b   : > { %1976 = vmatmul.mubr.f32.gmra.mrb[0].mxu1 %v1362_v11 }
 0x23c   : > { %1981 = vmatprep.mubr.f32.mxu1 %v4818_v44 }
 0x23f   : > { %1985 = vmatmul.mubr.f32.gmra.mrb[2].mxu1 %v1373_v18 }
 0x240   : > { %1990 = vmatprep.mubr.f32.mxu1 %v4818_v44 }
 0x243   : > { %1994 = vmatmul.mubr.f32.gmra.mrb[4].mxu1 %v1384_v36 }
 0x244   : > { %1999 = vmatprep.mubr.f32.mxu1 %v4818_v44 }
 0x247   : > { %2003 = vmatmul.mubr.f32.gmra.mrb[6].mxu1 %v1395_v23 }
 0x248   : > { %2008 = vmatprep.mubr.f32.mxu1 %v4818_v44 }
 0x24b   : > { %2012 = vmatmul.mubr.f32.gmra.mrb[8].mxu1 %v1406_v52 }
 0x24c   : > { %2017 = vmatprep.mubr.f32.mxu1 %v4818_v44 }
 0x24f   : > { %2021 = vmatmul.mubr.f32.gmra.mrb[10].mxu1 %v1417_v55 }
 0x250   : > { %2026 = vmatprep.mubr.f32.mxu1 %v4818_v44 }
 0x253   : > { %2030 = vmatmul.mubr.f32.gmra.mrb[12].mxu1 %v1428_v51 }
 0x254   : > { %2035 = vmatprep.mubr.f32.mxu1 %v4818_v44 }
 0x257   : > { %2039 = vmatmul.mubr.f32.gmra.mrb[14].mxu1 %v1439_v3 }
 0x258   : > { %2044 = vmatprep.mubr.f32.mxu1 %v4818_v44 }
 0x25b   : > { %2048 = vmatmul.mubr.f32.gmra.mrb[16].mxu1 %v1450_v26 }
 0x25c   : > { %2124 = vmatprep.mubr.f32.mxu1 %v4818_v44 }
 0x25f   : > { %2126 = vmatmul.mubr.f32.vlgmr.msra.gmra.mrb[18].mxu1 %v4012_v58 }
 0x260   : > { %2240 = vmatpush1.msra.mxu1 %v4021_v33  ;;  %2131 = vmatprep.mubr.f32.mxu1 %v4818_v44 }
 0x263   : > { %2133 = vmatmul.mubr.f32.gmra.mrb[20].mxu1 %v4072_v59 }
 0x264   : > { %2138 = vmatprep.mubr.f32.mxu1 %v4818_v44 }
 0x267   : > { %2140 = vmatmul.mubr.f32.gmra.mrb[22].mxu1 %v4094_v15 }
 0x268   : > { %2145 = vmatprep.mubr.f32.mxu1 %v4818_v44 }
 0x26b   : > { %2147 = vmatmul.mubr.f32.gmra.mrb[24].mxu1 %v4115_v39 }
 0x26c   : > { %2152 = vmatprep.mubr.f32.mxu1 %v4818_v44 }
 0x26f   : > { %2154 = vmatmul.mubr.f32.gmra.mrb[26].mxu1 %v4139_v30 }
 0x270   : > { %2159 = vmatprep.mubr.f32.mxu1 %v4818_v44 }
 0x273   : > { %2161 = vmatmul.mubr.f32.gmra.mrb[28].mxu1 %v4164_v2 }
 0x274   : > { %2166 = vmatprep.mubr.f32.mxu1 %v4818_v44 }
 0x277   : > { %2168 = vmatmul.mubr.f32.gmra.mrb[30].mxu1 %v4186_v38 }
 0x278   : > { %2173 = vmatprep.mubr.f32.mxu1 %v4818_v44 }
 0x27b   : > { %2175 = vmatmul.mubr.f32.gmra.mrb[0].mxu1 %v4055_v46 }
 0x27c   : > { %2180 = vmatprep.mubr.f32.mxu1 %v4818_v44 }
 0x27f   : > { %2182 = vmatmul.mubr.f32.gmra.mrb[2].mxu1 %v4070_v56 }
 0x280   : > { %2187 = vmatprep.mubr.f32.mxu1 %v4818_v44 }
 0x283   : > { %2189 = vmatmul.mubr.f32.gmra.mrb[4].mxu1 %v4089_v7 }
 0x284   : > { %2194 = vmatprep.mubr.f32.mxu1 %v4818_v44 }
 0x287   : > { %2196 = vmatmul.mubr.f32.gmra.mrb[6].mxu1 %v4110_v28 }
 0x288   : > { %2201 = vmatprep.mubr.f32.mxu1 %v4818_v44 }
 0x28b   : > { %2203 = vmatmul.mubr.f32.gmra.mrb[8].mxu1 %v4134_v31 }
 0x28c   : > { %2208 = vmatprep.mubr.f32.mxu1 %v4818_v44 }
 0x28f   : > { %2210 = vmatmul.mubr.f32.gmra.mrb[10].mxu1 %v4159_v20 }
 0x290   : > { %2215 = vmatprep.mubr.f32.mxu1 %v4818_v44 }
 0x293   : > { %2217 = vmatmul.mubr.f32.gmra.mrb[12].mxu1 %v4181_v57 }
 0x294   : > { %2222 = vmatprep.mubr.f32.mxu1 %v4818_v44 }
 0x297   : > { %2224 = vmatmul.mubr.f32.gmra.mrb[14].mxu1 %v4202_v61 }
 0x298   : > { %2229 = vmatprep.mubr.f32.mxu1 %v4818_v44 }
 0x29b   : > { %2231 = vmatmul.mubr.f32.gmra.mrb[16].mxu1 %v4218_v40 }
 0x29c   : > { %2303 = vmatprep.mubr.f32.mxu1 %v4818_v44 }
 0x29f   : > { %2305 = vmatmul.mubr.f32.vlgmr.msra.gmra.mrb[18].mxu1 %v4012_v58 }
 0x2a0   : > { %2310 = vmatprep.mubr.f32.mxu1 %v4818_v44 }
 0x2a3   : > { %2312 = vmatmul.mubr.f32.gmra.mrb[20].mxu1 %v4072_v59 }
 0x2a4   : > { %2317 = vmatprep.mubr.f32.mxu1 %v4818_v44  ;;  %v4451_v19 = vpop.f32.mrb[16].mxu0 }
 0x2a5   : > { %v4454_v58 = vpop.f32.mrb[17].mxu0 }
 0x2a7   : > { %2319 = vmatmul.mubr.f32.gmra.mrb[22].mxu1 %v4094_v15 }
 0x2a8   : > { %2324 = vmatprep.mubr.f32.mxu1 %v4818_v44  ;;  %v4457_v27 = vpop.f32.mrb[18].mxu0 }
 0x2a9   : > { %v4460_v33 = vpop.f32.mrb[19].mxu0 }
 0x2ab   : > { %2326 = vmatmul.mubr.f32.gmra.mrb[24].mxu1 %v4115_v39 }
 0x2ac   : > { %2331 = vmatprep.mubr.f32.mxu1 %v4818_v44 }
 0x2af   : > { %2333 = vmatmul.mubr.f32.gmra.mrb[26].mxu1 %v4139_v30 }
 0x2b0   : > { %2338 = vmatprep.mubr.f32.mxu1 %v4818_v44 }
 0x2b3   : > { %2340 = vmatmul.mubr.f32.gmra.mrb[28].mxu1 %v4164_v2 }
 0x2b4   : > { %2345 = vmatprep.mubr.f32.mxu1 %v4818_v44 }
 0x2b6   : > { %v4463_v42 = vpop.f32.mrb[20].mxu0 }
 0x2b7   : > { %2347 = vmatmul.mubr.f32.gmra.mrb[30].mxu1 %v4186_v38  ;;  %v4466_v10 = vpop.f32.mrb[21].mxu0 }
 0x2b8   : > { %2352 = vmatprep.mubr.f32.mxu1 %v4818_v44 }
 0x2ba   : > { %v4469_v24 = vpop.f32.mrb[22].mxu0 }
 0x2bb   : > { %2354 = vmatmul.mubr.f32.gmra.mrb[0].mxu1 %v4055_v46  ;;  %v4472_v59 = vpop.f32.mrb[23].mxu0 }
 0x2bc   : > { %2359 = vmatprep.mubr.f32.mxu1 %v4818_v44 }
 0x2be   : > { %v4475_v14 = vpop.f32.mrb[24].mxu0 }
 0x2bf   : > { %2361 = vmatmul.mubr.f32.gmra.mrb[2].mxu1 %v4070_v56  ;;  %v4478_v15 = vpop.f32.mrb[25].mxu0 }
 0x2c0   : > { %2366 = vmatprep.mubr.f32.mxu1 %v4818_v44 }
 0x2c2   : > { %v4481_v46 = vpop.f32.mrb[26].mxu0 }
 0x2c3   : > { %2368 = vmatmul.mubr.f32.gmra.mrb[4].mxu1 %v4089_v7  ;;  %v4484_v29 = vpop.f32.mrb[27].mxu0 }
 0x2c4   : > { %2373 = vmatprep.mubr.f32.mxu1 %v4818_v44 }
 0x2c6   : > { %v4487_v56 = vpop.f32.mrb[28].mxu0 }
 0x2c7   : > { %2375 = vmatmul.mubr.f32.gmra.mrb[6].mxu1 %v4110_v28  ;;  %v4490_v32 = vpop.f32.mrb[29].mxu0 }
 0x2c8   : > { %2380 = vmatprep.mubr.f32.mxu1 %v4818_v44 }
 0x2ca   : > { %v4493_v7 = vpop.f32.mrb[30].mxu0 }
 0x2cb   : > { %2382 = vmatmul.mubr.f32.gmra.mrb[8].mxu1 %v4134_v31  ;;  %v4496_v39 = vpop.f32.mrb[31].mxu0 }
 0x2cc   : > { %2387 = vmatprep.mubr.f32.mxu1 %v4818_v44 }
 0x2ce   : > { %v4499_v28 = vpop.f32.mrb[32].mxu0 }
 0x2cf   : > { %2389 = vmatmul.mubr.f32.gmra.mrb[10].mxu1 %v4159_v20  ;;  %v4502_v35 = vpop.f32.mrb[33].mxu0 }
 0x2d0   : > { %2394 = vmatprep.mubr.f32.mxu1 %v4818_v44 }
 0x2d2   : > { %v1536_v31 = vpop.f32.mrb[2].mxu0 }
 0x2d3   : > { %2396 = vmatmul.mubr.f32.gmra.mrb[12].mxu1 %v4181_v57  ;;  %v1538_v25 = vpop.f32.mrb[3].mxu0 }
 0x2d4   : > { %2401 = vmatprep.mubr.f32.mxu1 %v4818_v44 }
 0x2d6   : > { %v1543_v30 = vpop.f32.mrb[4].mxu0 }
 0x2d7   : > { %2403 = vmatmul.mubr.f32.gmra.mrb[14].mxu1 %v4202_v61  ;;  %v1545_v34 = vpop.f32.mrb[5].mxu0 }
 0x2d8   : > { %2408 = vmatprep.mubr.f32.mxu1 %v4818_v44 }
 0x2da   : > { %v1550_v20 = vpop.f32.mrb[6].mxu0 }
 0x2db   : > { %2410 = vmatmul.mubr.f32.gmra.mrb[16].mxu1 %v4218_v40  ;;  %v1552_v48 = vpop.f32.mrb[7].mxu0 }
 0x2de   : > { %v1557_v2 = vpop.f32.mrb[8].mxu0 }
 0x2df   : > { %v1559_v1 = vpop.f32.mrb[9].mxu0 }
 0x2e2   : > { %v1564_v57 = vpop.f32.mrb[10].mxu0 }
 0x2e3   : > { %v1566_v12 = vpop.f32.mrb[11].mxu0 }
 0x2e6   : > { %v4508_v38 = vpop.f32.mrb[12].mxu0 }
 0x2e7   : > { %v4510_v54 = vpop.f32.mrb[13].mxu0 }
 0x2ea   : > { %v4512_v62 = vpop.f32.mrb[14].mxu0 }
 0x2eb   : > { %v4514_v61 = vpop.f32.mrb[15].mxu0 }
 0x372   : > { %v2306_v44 = vpop.f32.mrb[18].mxu1 }
 0x373   : > { %v3084_v21 = vadd.f32 %v2306_v44, %v1536_v31  ;;  %v2308_v40 = vpop.f32.mrb[19].mxu1 }
 0x374   : > { %v3085_v50 = vadd.f32 %v2308_v40, %v1538_v25 }
 0x375   : > { %2416 = vst [vmem:[%s4520_s12] sm:$0xff] %v3084_v21  ;;  %v2853_v11 = vmul.f32 -1.442695, %v3084_v21 }
 0x376   : > { %2418 = vst.msk [vmem:[%s4520_s12 + $0x8] sm:$0xff] %vm2417_vm1, %v3085_v50  ;;  %v2854_v8 = vmul.f32 -1.442695, %v3085_v50  ;;  %v2313_v18 = vpop.f32.mrb[20].mxu1 }
 0x377   : > { %3279 = vpow2.f32 %v2853_v11  ;;  %v3086_v0 = vadd.f32 %v2313_v18, %v1543_v30  ;;  %v2315_v36 = vpop.f32.mrb[21].mxu1 }
 0x378   : > { %3281 = vpow2.f32 %v2854_v8  ;;  %v3087_v60 = vadd.f32 %v2315_v36, %v1545_v34 }
 0x379   : > { %2419 = vst [vmem:[%s4520_s12 + $0x10] sm:$0xff] %v3086_v0  ;;  %v2855_v23 = vmul.f32 -1.442695, %v3086_v0 }
 0x37a   : > { %2420 = vst.msk [vmem:[%s4520_s12 + $0x18] sm:$0xff] %vm2417_vm1, %v3087_v60  ;;  %v2856_v4 = vmul.f32 -1.442695, %v3087_v60  ;;  %v2320_v52 = vpop.f32.mrb[22].mxu1 }
 0x37b   : > { %3283 = vpow2.f32 %v2855_v23  ;;  %v3088_v5 = vadd.f32 %v2320_v52, %v1550_v20  ;;  %v2322_v53 = vpop.f32.mrb[23].mxu1 }
 0x37c   : > { %3285 = vpow2.f32 %v2856_v4  ;;  %v3089_v45 = vadd.f32 %v2322_v53, %v1552_v48 }
 0x37d   : > { %2421 = vst [vmem:[%s4520_s12 + $0x20] sm:$0xff] %v3088_v5  ;;  %v2857_v55 = vmul.f32 -1.442695, %v3088_v5  ;;  %v3407_v5 = vld [vmem:[%s3520_s24] sm:$0xff] }
 0x37e   : > { %2422 = vst.msk [vmem:[%s4520_s12 + $0x28] sm:$0xff] %vm2417_vm1, %v3089_v45  ;;  %v2858_v63 = vmul.f32 -1.442695, %v3089_v45  ;;  %v2327_v22 = vpop.f32.mrb[24].mxu1 }
 0x37f   : > { %3287 = vpow2.f32 %v2857_v55  ;;  %v3090_v41 = vadd.f32 %v2327_v22, %v1557_v2  ;;  %v2329_v51 = vpop.f32.mrb[25].mxu1  ;;  %v3408_v22 = vld [vmem:[%s3520_s24 + $0x8] sm:$0xff] }
 0x380   : > { %3289 = vpow2.f32 %v2858_v63  ;;  %v3091_v13 = vadd.f32 %v2329_v51, %v1559_v1 }
 0x381   : > { %v3280_v37 = vpop.eup %3279  ;;  %2423 = vst [vmem:[%s4520_s12 + $0x30] sm:$0xff] %v3090_v41  ;;  %v2859_v6 = vmul.f32 -1.442695, %v3090_v41 }
 0x382   : > { %v3282_v3 = vpop.eup %3281  ;;  %v2545_v47 = vadd.f32 1.0, %v3280_v37  ;;  %2424 = vst.msk [vmem:[%s4520_s12 + $0x38] sm:$0xff] %vm2417_vm1, %v3091_v13  ;;  %v2860_v49 = vmul.f32 -1.442695, %v3091_v13  ;;  %v2334_v43 = vpop.f32.mrb[26].mxu1 }
 0x383   : > { %v2546_v26 = vadd.f32 1.0, %v3282_v3  ;;  %3291 = vpow2.f32 %v2859_v6  ;;  %v3092_v9 = vadd.f32 %v2334_v43, %v1564_v57  ;;  %v2336_v17 = vpop.f32.mrb[27].mxu1 }
 0x384   : > { %3293 = vrcp.f32 %v2545_v47  ;;  %v3093_v16 = vadd.f32 %v2336_v17, %v1566_v12 }
 0x385   : > { %v3284_v31 = vpop.eup %3283  ;;  %3295 = vrcp.f32 %v2546_v26  ;;  %2425 = vst [vmem:[%s4520_s12 + $0x40] sm:$0xff] %v3092_v9  ;;  %v2861_v25 = vmul.f32 -1.442695, %v3092_v9  ;;  %v3409_v26 = vld [vmem:[%s3520_s24 + $0x10] sm:$0xff] }
 0x386   : > { %v3286_v30 = vpop.eup %3285  ;;  %v2547_v34 = vadd.f32 1.0, %v3284_v31  ;;  %3297 = vpow2.f32 %v2860_v49  ;;  %2426 = vst.msk [vmem:[%s4520_s12 + $0x48] sm:$0xff] %vm2417_vm1, %v3093_v16  ;;  %v2862_v20 = vmul.f32 -1.442695, %v3093_v16  ;;  %v2341_v48 = vpop.f32.mrb[28].mxu1  ;;  %v3410_v31 = vld [vmem:[%s3520_s24 + $0x18] sm:$0xff] }
 0x387   : > { %v2548_v2 = vadd.f32 1.0, %v3286_v30  ;;  %3299 = vpow2.f32 %v2861_v25  ;;  %v3094_v1 = vadd.f32 %v2341_v48, %v4508_v38  ;;  %v2343_v57 = vpop.f32.mrb[29].mxu1 }
 0x388   : > { %3301 = vrcp.f32 %v2547_v34  ;;  %v3095_v12 = vadd.f32 %v2343_v57, %v4510_v54 }
 0x389   : > { %v3288_v44 = vpop.eup %3287  ;;  %3303 = vrcp.f32 %v2548_v2  ;;  %2427 = vst [vmem:[%s4520_s12 + $0x50] sm:$0xff] %v3094_v1  ;;  %v2863_v21 = vmul.f32 -1.442695, %v3094_v1 }
 0x38a   : > { %v3290_v40 = vpop.eup %3289  ;;  %v2549_v50 = vadd.f32 1.0, %v3288_v44  ;;  %3305 = vpow2.f32 %v2862_v20  ;;  %2428 = vst.msk [vmem:[%s4520_s12 + $0x58] sm:$0xff] %vm2417_vm1, %v3095_v12  ;;  %v2864_v11 = vmul.f32 -1.442695, %v3095_v12  ;;  %v2348_v8 = vpop.f32.mrb[30].mxu1 }
 0x38b   : > { %v2550_v18 = vadd.f32 1.0, %v3290_v40  ;;  %3307 = vpow2.f32 %v2863_v21  ;;  %v3096_v38 = vadd.f32 %v2348_v8, %v4512_v62  ;;  %v2350_v54 = vpop.f32.mrb[31].mxu1 }
 0x38c   : > { %3309 = vrcp.f32 %v2549_v50  ;;  %v3097_v0 = vadd.f32 %v2350_v54, %v4514_v61 }
 0x38d   : > { %v3292_v36 = vpop.eup %3291  ;;  %3311 = vrcp.f32 %v2550_v18  ;;  %2429 = vst [vmem:[%s4520_s12 + $0x60] sm:$0xff] %v3096_v38  ;;  %v2865_v60 = vmul.f32 -1.442695, %v3096_v38 }
 0x38e   : > { %v3294_v23 = vpop.eup %3293  ;;  %v2551_v4 = vadd.f32 1.0, %v3292_v36  ;;  %3313 = vpow2.f32 %v2864_v11  ;;  %2430 = vst.msk [vmem:[%s4520_s12 + $0x68] sm:$0xff] %vm2417_vm1, %v3097_v0  ;;  %v2866_v62 = vmul.f32 -1.442695, %v3097_v0  ;;  %v2355_v52 = vpop.f32.mrb[0].mxu1  ;;  %v3412_v11 = vld [vmem:[%s3520_s24 + $0x28] sm:$0xff] }
 0x38f   : > { %v3296_v61 = vpop.eup %3295  ;;  %v2641_v53 = vmul.f32 %v3407_v5, %v3294_v23  ;;  %3315 = vpow2.f32 %v2865_v60  ;;  %v3098_v45 = vadd.f32 %v2355_v52, %v4451_v19  ;;  %v2357_v55 = vpop.f32.mrb[1].mxu1 }
 0x390   : > { %v3298_v63 = vpop.eup %3297  ;;  %v2642_v41 = vmul.f32 %v3408_v22, %v3296_v61  ;;  %3317 = vrcp.f32 %v2551_v4  ;;  %v3099_v51 = vadd.f32 %v2357_v55, %v4454_v58  ;;  %v3413_v4 = vld [vmem:[%s3520_s24 + $0x30] sm:$0xff]  ;;  %v3414_v22 = vld [vmem:[%s3520_s24 + $0x38] sm:$0xff] }
 0x391   : > { %v3300_v13 = vpop.eup %3299  ;;  %2673 = vst [vmem:[%s4549_s15] sm:$0xff] %v2641_v53  ;;  %v2552_v37 = vadd.f32 1.0, %v3298_v63  ;;  %3319 = vpow2.f32 %v2866_v62  ;;  %2431 = vst [vmem:[%s4520_s12 + $0x70] sm:$0xff] %v3098_v45  ;;  %v2867_v6 = vmul.f32 -1.442695, %v3098_v45 }
 0x392   : > { %v3302_v3 = vpop.eup %3301  ;;  %2674 = vst.msk [vmem:[%s4549_s15 + $0x8] sm:$0xff] %vm2417_vm1, %v2642_v41  ;;  %v2553_v19 = vadd.f32 1.0, %v3300_v13  ;;  %2432 = vst.msk [vmem:[%s4520_s12 + $0x78] sm:$0xff] %vm2417_vm1, %v3099_v51  ;;  %v2868_v47 = vmul.f32 -1.442695, %v3099_v51  ;;  %v2362_v49 = vpop.f32.mrb[2].mxu1 }
 0x393   : > { %v3304_v43 = vpop.eup %3303  ;;  %v2643_v58 = vmul.f32 %v3409_v26, %v3302_v3  ;;  %3321 = vrcp.f32 %v2552_v37  ;;  %v3100_v9 = vadd.f32 %v2362_v49, %v4457_v27  ;;  %v2364_v17 = vpop.f32.mrb[3].mxu1  ;;  %v3415_v37 = vld [vmem:[%s3520_s24 + $0x40] sm:$0xff] }
 0x394   : > { %v3306_v16 = vpop.eup %3305  ;;  %v2644_v25 = vmul.f32 %v3410_v31, %v3304_v43  ;;  %3323 = vrcp.f32 %v2553_v19  ;;  %v3101_v30 = vadd.f32 %v2364_v17, %v4460_v33  ;;  %v3411_v33 = vld [vmem:[%s3520_s24 + $0x20] sm:$0xff]  ;;  %v3416_v17 = vld [vmem:[%s3520_s24 + $0x48] sm:$0xff] }
 0x395   : > { %v3308_v34 = vpop.eup %3307  ;;  %2675 = vst [vmem:[%s4549_s15 + $0x10] sm:$0xff] %v2643_v58  ;;  %v2554_v20 = vadd.f32 1.0, %v3306_v16  ;;  %3325 = vpow2.f32 %v2867_v6  ;;  %2433 = vst [vmem:[%s4520_s12 + $0x80] sm:$0xff] %v3100_v9  ;;  %v2869_v48 = vmul.f32 -1.442695, %v3100_v9 }
 0x396   : > { %v3310_v2 = vpop.eup %3309  ;;  %2676 = vst.msk [vmem:[%s4549_s15 + $0x18] sm:$0xff] %vm2417_vm1, %v2644_v25  ;;  %v2555_v27 = vadd.f32 1.0, %v3308_v34  ;;  %3327 = vpow2.f32 %v2868_v47  ;;  %2434 = vst.msk [vmem:[%s4520_s12 + $0x88] sm:$0xff] %vm2417_vm1, %v3101_v30  ;;  %v2870_v1 = vmul.f32 -1.442695, %v3101_v30  ;;  %v2369_v57 = vpop.f32.mrb[4].mxu1 }
 0x397   : > { %v3312_v12 = vpop.eup %3311  ;;  %v2645_v44 = vmul.f32 %v3411_v33, %v3310_v2  ;;  %3329 = vrcp.f32 %v2554_v20  ;;  %v3102_v21 = vadd.f32 %v2369_v57, %v4463_v42  ;;  %v2371_v40 = vpop.f32.mrb[5].mxu1  ;;  %v3417_v30 = vld [vmem:[%s3520_s24 + $0x50] sm:$0xff] }
 0x398   : > { %v3314_v50 = vpop.eup %3313  ;;  %v2646_v8 = vmul.f32 %v3412_v11, %v3312_v12  ;;  %3331 = vrcp.f32 %v2555_v27  ;;  %v3103_v18 = vadd.f32 %v2371_v40, %v4466_v10 }
 0x399   : > { %v3316_v38 = vpop.eup %3315  ;;  %2677 = vst [vmem:[%s4549_s15 + $0x20] sm:$0xff] %v2645_v44  ;;  %v2556_v54 = vadd.f32 1.0, %v3314_v50  ;;  %3333 = vpow2.f32 %v2869_v48  ;;  %2435 = vst [vmem:[%s4520_s12 + $0x90] sm:$0xff] %v3102_v21  ;;  %v2871_v0 = vmul.f32 -1.442695, %v3102_v21  ;;  %v3418_v44 = vld [vmem:[%s3520_s24 + $0x58] sm:$0xff] }
 0x39a   : > { %v3318_v36 = vpop.eup %3317  ;;  %2678 = vst.msk [vmem:[%s4549_s15 + $0x28] sm:$0xff] %vm2417_vm1, %v2646_v8  ;;  %v2557_v42 = vadd.f32 1.0, %v3316_v38  ;;  %3335 = vpow2.f32 %v2870_v1  ;;  %2436 = vst.msk [vmem:[%s4520_s12 + $0x98] sm:$0xff] %vm2417_vm1, %v3103_v18  ;;  %v2376_v60 = vpop.f32.mrb[6].mxu1  ;;  %v2872_v62 = vmul.f32 -1.442695, %v3103_v18 }
 0x39b   : > { %v3320_v23 = vpop.eup %3319  ;;  %v2647_v10 = vmul.f32 %v3413_v4, %v3318_v36  ;;  %3337 = vrcp.f32 %v2556_v54  ;;  %v3104_v52 = vadd.f32 %v2376_v60, %v4469_v24  ;;  %v2378_v61 = vpop.f32.mrb[7].mxu1 }
 0x39c   : > { %3339 = vrcp.f32 %v2557_v42  ;;  %v2558_v5 = vadd.f32 1.0, %v3320_v23  ;;  %v3105_v53 = vadd.f32 %v2378_v61, %v4472_v59  ;;  %v3420_v42 = vld [vmem:[%s3520_s24 + $0x68] sm:$0xff] }
 0x39d   : > { %v3322_v45 = vpop.eup %3321  ;;  %2679 = vst [vmem:[%s4549_s15 + $0x30] sm:$0xff] %v2647_v10  ;;  %3341 = vpow2.f32 %v2871_v0  ;;  %2437 = vst [vmem:[%s4520_s12 + $0xa0] sm:$0xff] %v3104_v52  ;;  %v2873_v55 = vmul.f32 -1.442695, %v3104_v52 }
 0x39e   : > { %v3324_v63 = vpop.eup %3323  ;;  %v2648_v41 = vmul.f32 %v3414_v22, %v3322_v45  ;;  %3343 = vrcp.f32 %v2558_v5  ;;  %2438 = vst.msk [vmem:[%s4520_s12 + $0xa8] sm:$0xff] %vm2417_vm1, %v3105_v53  ;;  %v2874_v24 = vmul.f32 -1.442695, %v3105_v53  ;;  %v2383_v51 = vpop.f32.mrb[8].mxu1  ;;  %v3421_v22 = vld [vmem:[%s3520_s24 + $0x70] sm:$0xff] }
 0x39f   : > { %v3326_v13 = vpop.eup %3325  ;;  %v2649_v6 = vmul.f32 %v3415_v37, %v3324_v63  ;;  %3345 = vpow2.f32 %v2872_v62  ;;  %v3106_v59 = vadd.f32 %v2383_v51, %v4475_v14  ;;  %v2385_v3 = vpop.f32.mrb[9].mxu1 }
 0x3a0   : > { %v3328_v19 = vpop.eup %3327  ;;  %2680 = vst.msk [vmem:[%s4549_s15 + $0x38] sm:$0xff] %vm2417_vm1, %v2648_v41  ;;  %v2559_v47 = vadd.f32 1.0, %v3326_v13  ;;  %3347 = vpow2.f32 %v2873_v55  ;;  %v3107_v49 = vadd.f32 %v2385_v3, %v4478_v15  ;;  %v3422_v13 = vld [vmem:[%s3520_s24 + $0x78] sm:$0xff] }
 0x3a1   : > { %v3330_v43 = vpop.eup %3329  ;;  %2681 = vst [vmem:[%s4549_s15 + $0x40] sm:$0xff] %v2649_v6  ;;  %v2560_v26 = vadd.f32 1.0, %v3328_v19  ;;  %3349 = vpow2.f32 %v2874_v24  ;;  %2439 = vst [vmem:[%s4520_s12 + $0xb0] sm:$0xff] %v3106_v59  ;;  %v2875_v58 = vmul.f32 -1.442695, %v3106_v59 }
 0x3a2   : > { %v3332_v9 = vpop.eup %3331  ;;  %v2650_v14 = vmul.f32 %v3416_v17, %v3330_v43  ;;  %3351 = vrcp.f32 %v2559_v47  ;;  %2440 = vst.msk [vmem:[%s4520_s12 + $0xb8] sm:$0xff] %vm2417_vm1, %v3107_v49  ;;  %v2876_v16 = vmul.f32 -1.442695, %v3107_v49  ;;  %v2390_v31 = vpop.f32.mrb[10].mxu1 }
 0x3a3   : > { %v3334_v25 = vpop.eup %3333  ;;  %v2651_v15 = vmul.f32 %v3417_v30, %v3332_v9  ;;  %3353 = vrcp.f32 %v2560_v26  ;;  %v3108_v34 = vadd.f32 %v2390_v31, %v4481_v46  ;;  %v2392_v20 = vpop.f32.mrb[11].mxu1 }
 0x3a4   : > { %v3336_v48 = vpop.eup %3335  ;;  %2682 = vst.msk [vmem:[%s4549_s15 + $0x48] sm:$0xff] %vm2417_vm1, %v2650_v14  ;;  %v2561_v2 = vadd.f32 1.0, %v3334_v25  ;;  %3355 = vpow2.f32 %v2875_v58  ;;  %v3109_v27 = vadd.f32 %v2392_v20, %v4484_v29  ;;  %v3419_v29 = vld [vmem:[%s3520_s24 + $0x60] sm:$0xff]  ;;  %v3425_v20 = vld [vmem:[%s3520_s24 + $0x90] sm:$0xff] }
 0x3a5   : > { %v3338_v1 = vpop.eup %3337  ;;  %2683 = vst [vmem:[%s4549_s15 + $0x50] sm:$0xff] %v2651_v15  ;;  %v2562_v57 = vadd.f32 1.0, %v3336_v48  ;;  %3357 = vpow2.f32 %v2876_v16  ;;  %2441 = vst [vmem:[%s4520_s12 + $0xc0] sm:$0xff] %v3108_v34  ;;  %v2877_v12 = vmul.f32 -1.442695, %v3108_v34  ;;  %v3423_v58 = vld [vmem:[%s3520_s24 + $0x80] sm:$0xff] }
 0x3a6   : > { %v3340_v33 = vpop.eup %3339  ;;  %v2652_v46 = vmul.f32 %v3418_v44, %v3338_v1  ;;  %3359 = vrcp.f32 %v2561_v2  ;;  %2442 = vst.msk [vmem:[%s4520_s12 + $0xc8] sm:$0xff] %vm2417_vm1, %v3109_v27  ;;  %v2878_v21 = vmul.f32 -1.442695, %v3109_v27  ;;  %v2397_v40 = vpop.f32.mrb[12].mxu1  ;;  %v3427_v44 = vld [vmem:[%s3520_s24 + $0xa0] sm:$0xff] }
 0x3a7   : > { %v3342_v50 = vpop.eup %3341  ;;  %v2653_v11 = vmul.f32 %v3419_v29, %v3340_v33  ;;  %3361 = vrcp.f32 %v2562_v57  ;;  %v3110_v8 = vadd.f32 %v2397_v40, %v4487_v56  ;;  %v2399_v18 = vpop.f32.mrb[13].mxu1  ;;  %v3426_v57 = vld [vmem:[%s3520_s24 + $0x98] sm:$0xff]  ;;  %v3428_v40 = vld [vmem:[%s3520_s24 + $0xa8] sm:$0xff] }
 0x3a8   : > { %v3344_v38 = vpop.eup %3343  ;;  %2684 = vst.msk [vmem:[%s4549_s15 + $0x58] sm:$0xff] %vm2417_vm1, %v2652_v46  ;;  %v2563_v54 = vadd.f32 1.0, %v3342_v50  ;;  %3363 = vpow2.f32 %v2877_v12  ;;  %v3111_v0 = vadd.f32 %v2399_v18, %v4490_v32 }
 0x3a9   : > { %v3346_v36 = vpop.eup %3345  ;;  %2685 = vst [vmem:[%s4549_s15 + $0x60] sm:$0xff] %v2653_v11  ;;  %v2654_v60 = vmul.f32 %v3420_v42, %v3344_v38  ;;  %3365 = vpow2.f32 %v2878_v21  ;;  %2443 = vst [vmem:[%s4520_s12 + $0xd0] sm:$0xff] %v3110_v8  ;;  %v2879_v23 = vmul.f32 -1.442695, %v3110_v8  ;;  %v3430_v42 = vld [vmem:[%s3520_s24 + $0xb8] sm:$0xff] }
 0x3aa   : > { %v3348_v4 = vpop.eup %3347  ;;  %3367 = vrcp.f32 %v2563_v54  ;;  %v2564_v56 = vadd.f32 1.0, %v3346_v36  ;;  %2444 = vst.msk [vmem:[%s4520_s12 + $0xd8] sm:$0xff] %vm2417_vm1, %v3111_v0  ;;  %v2404_v10 = vpop.f32.mrb[14].mxu1  ;;  %v2880_v32 = vmul.f32 -1.442695, %v3111_v0  ;;  %v3429_v54 = vld [vmem:[%s3520_s24 + $0xb0] sm:$0xff] }
 0x3ab   : > { %v3350_v62 = vpop.eup %3349  ;;  %2686 = vst.msk [vmem:[%s4549_s15 + $0x68] sm:$0xff] %vm2417_vm1, %v2654_v60  ;;  %v2565_v52 = vadd.f32 1.0, %v3348_v4  ;;  %3369 = vpow2.f32 %v2879_v23  ;;  %v3112_v61 = vadd.f32 %v2404_v10, %v4493_v7  ;;  %v2406_v5 = vpop.f32.mrb[15].mxu1 }
 0x3ac   : > { %v3352_v53 = vpop.eup %3351  ;;  %3371 = vrcp.f32 %v2564_v56  ;;  %v2566_v45 = vadd.f32 1.0, %v3350_v62  ;;  %v3113_v55 = vadd.f32 %v2406_v5, %v4496_v39  ;;  %v3432_v5 = vld [vmem:[%s3520_s24 + $0xc8] sm:$0xff] }
 0x3ad   : > { %v3354_v63 = vpop.eup %3353  ;;  %v2655_v41 = vmul.f32 %v3421_v22, %v3352_v53  ;;  %3373 = vrcp.f32 %v2565_v52  ;;  %2445 = vst [vmem:[%s4520_s12 + $0xe0] sm:$0xff] %v3112_v61  ;;  %v2881_v24 = vmul.f32 -1.442695, %v3112_v61  ;;  %v3431_v52 = vld [vmem:[%s3520_s24 + $0xc0] sm:$0xff] }
 0x3ae   : > { %v3356_v51 = vpop.eup %3355  ;;  %v2656_v37 = vmul.f32 %v3422_v13, %v3354_v63  ;;  %3375 = vrcp.f32 %v2566_v45  ;;  %2446 = vst.msk [vmem:[%s4520_s12 + $0xe8] sm:$0xff] %vm2417_vm1, %v3113_v55  ;;  %v2411_v7 = vpop.f32.mrb[16].mxu1  ;;  %v2882_v39 = vmul.f32 -1.442695, %v3113_v55  ;;  %v3433_v63 = vld [vmem:[%s3520_s24 + $0xd0] sm:$0xff] }
 0x3af   : > { %v3358_v6 = vpop.eup %3357  ;;  %2687 = vst [vmem:[%s4549_s15 + $0x70] sm:$0xff] %v2655_v41  ;;  %v2567_v59 = vadd.f32 1.0, %v3356_v51  ;;  %3377 = vpow2.f32 %v2880_v32  ;;  %v3114_v3 = vadd.f32 %v2411_v7, %v4499_v28  ;;  %v2413_v19 = vpop.f32.mrb[17].mxu1  ;;  %v3424_v28 = vld [vmem:[%s3520_s24 + $0x88] sm:$0xff]  ;;  %v3434_v51 = vld [vmem:[%s3520_s24 + $0xd8] sm:$0xff] }
 0x3b0   : > { %v3360_v47 = vpop.eup %3359  ;;  %2688 = vst.msk [vmem:[%s4549_s15 + $0x78] sm:$0xff] %vm2417_vm1, %v2656_v37  ;;  %v2568_v49 = vadd.f32 1.0, %v3358_v6  ;;  %3379 = vpow2.f32 %v2881_v24  ;;  %v3115_v43 = vadd.f32 %v2413_v19, %v4502_v35  ;;  %v3435_v37 = vld [vmem:[%s3520_s24 + $0xe0] sm:$0xff]  ;;  %v3437_v19 = vld [vmem:[%s3520_s24 + $0xf0] sm:$0xff] }
 0x3b1   : > { %v3362_v26 = vpop.eup %3361  ;;  %v2657_v9 = vmul.f32 %v3423_v58, %v3360_v47  ;;  %3381 = vrcp.f32 %v2567_v59  ;;  %2447 = vst [vmem:[%s4520_s12 + $0xf0] sm:$0xff] %v3114_v3  ;;  %v2883_v17 = vmul.f32 -1.442695, %v3114_v3 }
 0x3b2   : > { %v3364_v14 = vpop.eup %3363  ;;  %v2658_v16 = vmul.f32 %v3424_v28, %v3362_v26  ;;  %3383 = vrcp.f32 %v2568_v49  ;;  %2448 = vst.msk [vmem:[%s4520_s12 + $0xf8] sm:$0xff] %vm2417_vm1, %v3115_v43  ;;  %v2884_v35 = vmul.f32 -1.442695, %v3115_v43  ;;  %v3438_v43 = vld [vmem:[%s3520_s24 + $0xf8] sm:$0xff] }
 0x3b3   : > { %v3366_v31 = vpop.eup %3365  ;;  %2689 = vst [vmem:[%s4549_s15 + $0x80] sm:$0xff] %v2657_v9  ;;  %v2569_v25 = vadd.f32 1.0, %v3364_v14  ;;  %3385 = vpow2.f32 %v2882_v39  ;;  %v3436_v39 = vld [vmem:[%s3520_s24 + $0xe8] sm:$0xff] }
 0x3b4   : > { %v3368_v30 = vpop.eup %3367  ;;  %2690 = vst.msk [vmem:[%s4549_s15 + $0x88] sm:$0xff] %vm2417_vm1, %v2658_v16  ;;  %v2570_v15 = vadd.f32 1.0, %v3366_v31  ;;  %3387 = vpow2.f32 %v2883_v17 }
 0x3b5   : > { %v3370_v34 = vpop.eup %3369  ;;  %v2659_v48 = vmul.f32 %v3425_v20, %v3368_v30  ;;  %3389 = vrcp.f32 %v2569_v25 }
 0x3b6   : > { %v3372_v2 = vpop.eup %3371  ;;  %3391 = vrcp.f32 %v2570_v15  ;;  %v2571_v27 = vadd.f32 1.0, %v3370_v34 }
 0x3b7   : > { %v3374_v1 = vpop.eup %3373  ;;  %2691 = vst [vmem:[%s4549_s15 + $0x90] sm:$0xff] %v2659_v48  ;;  %v2660_v12 = vmul.f32 %v3426_v57, %v3372_v2  ;;  %3393 = vpow2.f32 %v2884_v35 }
 0x3b8   : > { %v3376_v33 = vpop.eup %3375  ;;  %v2661_v46 = vmul.f32 %v3427_v44, %v3374_v1  ;;  %3395 = vrcp.f32 %v2571_v27 }
 0x3b9   : > { %v3378_v21 = vpop.eup %3377  ;;  %2692 = vst.msk [vmem:[%s4549_s15 + $0x98] sm:$0xff] %vm2417_vm1, %v2660_v12  ;;  %v2662_v50 = vmul.f32 %v3428_v40, %v3376_v33 }
 0x3ba   : > { %v3380_v29 = vpop.eup %3379  ;;  %2693 = vst [vmem:[%s4549_s15 + $0xa0] sm:$0xff] %v2661_v46  ;;  %v2572_v11 = vadd.f32 1.0, %v3378_v21 }
 0x3bb   : > { %v3382_v8 = vpop.eup %3381  ;;  %2694 = vst.msk [vmem:[%s4549_s15 + $0xa8] sm:$0xff] %vm2417_vm1, %v2662_v50  ;;  %v2573_v18 = vadd.f32 1.0, %v3380_v29 }
 0x3bc   : > { %v3384_v38 = vpop.eup %3383  ;;  %v2663_v0 = vmul.f32 %v3429_v54, %v3382_v8  ;;  %3397 = vrcp.f32 %v2572_v11 }
 0x3bd   : > { %v3386_v36 = vpop.eup %3385  ;;  %v2664_v60 = vmul.f32 %v3430_v42, %v3384_v38  ;;  %3399 = vrcp.f32 %v2573_v18 }
 0x3be   : > { %v3388_v23 = vpop.eup %3387  ;;  %2695 = vst [vmem:[%s4549_s15 + $0xb0] sm:$0xff] %v2663_v0  ;;  %v2574_v4 = vadd.f32 1.0, %v3386_v36 }
 0x3bf   : > { %v3390_v56 = vpop.eup %3389  ;;  %2696 = vst.msk [vmem:[%s4549_s15 + $0xb8] sm:$0xff] %vm2417_vm1, %v2664_v60  ;;  %v2575_v10 = vadd.f32 1.0, %v3388_v23 }
 0x3c0   : > { %v3392_v62 = vpop.eup %3391  ;;  %v2665_v32 = vmul.f32 %v3431_v52, %v3390_v56  ;;  %3401 = vrcp.f32 %v2574_v4 }
 0x3c1   : > { %v3394_v61 = vpop.eup %3393  ;;  %v2666_v53 = vmul.f32 %v3432_v5, %v3392_v62  ;;  %3403 = vrcp.f32 %v2575_v10 }
 0x3c2   : > { %v3396_v45 = vpop.eup %3395  ;;  %2697 = vst [vmem:[%s4549_s15 + $0xc0] sm:$0xff] %v2665_v32  ;;  %v2576_v55 = vadd.f32 1.0, %v3394_v61 }
 0x3c3   : > { %2698 = vst.msk [vmem:[%s4549_s15 + $0xc8] sm:$0xff] %vm2417_vm1, %v2666_v53  ;;  %v2667_v22 = vmul.f32 %v3433_v63, %v3396_v45 }
 0x3c4   : > { %3405 = vrcp.f32 %v2576_v55 }
 0x3c5   : > { %2699 = vst [vmem:[%s4549_s15 + $0xd0] sm:$0xff] %v2667_v22 }
 0x3c6   : > { %v3398_v41 = vpop.eup %3397 }
 0x3c7   : > { %v3400_v24 = vpop.eup %3399  ;;  %v2668_v13 = vmul.f32 %v3434_v51, %v3398_v41 }
 0x3c8   : > { %v2669_v7 = vmul.f32 %v3435_v37, %v3400_v24 }
 0x3c9   : > { %2700 = vst.msk [vmem:[%s4549_s15 + $0xd8] sm:$0xff] %vm2417_vm1, %v2668_v13 }
 0x3ca   : > { %v3402_v6 = vpop.eup %3401  ;;  %2701 = vst [vmem:[%s4549_s15 + $0xe0] sm:$0xff] %v2669_v7 }
 0x3cb   : > { %v3404_v59 = vpop.eup %3403  ;;  %v2670_v3 = vmul.f32 %v3436_v39, %v3402_v6 }
 0x3cc   : > { %v2671_v47 = vmul.f32 %v3437_v19, %v3404_v59 }
 0x3cd   : > { %2702 = vst.msk [vmem:[%s4549_s15 + $0xe8] sm:$0xff] %vm2417_vm1, %v2670_v3 }
 0x3ce   : > { %v3406_v49 = vpop.eup %3405  ;;  %2703 = vst [vmem:[%s4549_s15 + $0xf0] sm:$0xff] %v2671_v47 }
 0x3cf   : > { %v2672_v26 = vmul.f32 %v3438_v43, %v3406_v49 }
 0x3d1   : > { %2704 = vst.msk [vmem:[%s4549_s15 + $0xf8] sm:$0xff] %vm2417_vm1, %v2672_v26 }
 0x3d2 PF: > { %s15_s17 = sadd.s32 1, %s3461_s17   ;;  %s4845_s15 = smov %s3457_s16 }
 0x3d3   : > { %p12_p5 = scmp.ge.s32.totalorder %s15_s17, 4   ;;  %s4846_s16 = smov %s4848_s18 }
 0x3d5   :  { %14 = sbr.rel (!%p12_p5) target bundleno = 2 (0x2), region = 74 }

</bundles_post_ra>
